<compile_context>
chip_gen: v7x
topology: tpu7x:2x2x1
jax: 0.10.0
libtpu: 0.0.40
codegen_flags: <defaults>
</compile_context>

<pallas_src>
import functools

import jax
import jax.numpy as jnp
from jax.experimental import pallas as pl
from jax.experimental.pallas import tpu as pltpu


def _conv_block_kernel(x_ref, w_ref, params_ref, out_ref, *,
                       B, Hp, Wp, Cin, Cout, KH, KW):
    """One grid step processes a block of B samples.

    x_ref      : (B, Hp+1, Wp+1, 4*Cin)  zero-padded NHWC input with the four
                 (row,col) parity planes folded into the channel dim:
                 x_ref[n,u,v,(2a+c)*Cin:(2a+c+1)*Cin] == x_padded[n, 2u+a, 2v+c, :]
    w_ref      : (KH*KW*Cin, Cout)  conv weights, row = (kh*KW + kw)*Cin + ci
    params_ref : (3, Cout) f32      rows = [conv bias, GN gamma, GN beta]
    out_ref    : (B, Hp*Wp, Cout)   pooled output, row = ph*Wp + pw
    """
    Q = Hp * Wp
    K = KH * KW * Cin
    inv_cnt = 1.0 / float(4 * Q * Cout)   # GroupNorm(groups=1): count = H*W*Cout per sample

    # ---- 16 distinct shifted patches, computed once and reused ----------------
    # patches[(s_r, s_c)][b, q, :] == x_padded[b, 2*ph + s_r, 2*pw + s_c, :], q = ph*Wp + pw
    patches = {}
    for s_r in range(KH + 1):
        for s_c in range(KW + 1):
            a, ro = s_r % 2, s_r // 2
            c, co = s_c % 2, s_c // 2
            p = 2 * a + c                                   # parity plane index
            patch = x_ref[:, ro:ro + Hp, co:co + Wp, p * Cin:(p + 1) * Cin]
            patches[(s_r, s_c)] = patch.reshape(B, Q, Cin)

    # ---- ONE stacked im2col matmul for all quadrants & all B samples ----------
    # Quadrant (i, j) holds the conv outputs at (h, w) = (2*ph + i, 2*pw + j).
    quads = []
    for i in range(2):
        for j in range(2):
            quads.append(jnp.concatenate(
                [patches[(i + kh, j + kw)] for kh in range(KH) for kw in range(KW)],
                axis=-1))                                   # (B, Q, K)
    lhs = jnp.concatenate(quads, axis=1)                    # (B, 4*Q, K)
    acc = jnp.dot(lhs.reshape(B * 4 * Q, K), w_ref[...],
                  preferred_element_type=jnp.float32)       # (B*4*Q, Cout) f32
    acc = acc + params_ref[0:1, :]                          # + conv bias
    acc4 = acc.reshape(B, 4, Q, Cout)

    # ---- GroupNorm(num_groups=1) stats: VPU pre-sum, 2 cross-lane reductions --
    q_sum = acc4[:, 0] + acc4[:, 1] + acc4[:, 2] + acc4[:, 3]               # (B, Q, Cout)
    q_sq = (acc4[:, 0] * acc4[:, 0] + acc4[:, 1] * acc4[:, 1]
            + acc4[:, 2] * acc4[:, 2] + acc4[:, 3] * acc4[:, 3])
    ssum = jnp.sum(jnp.sum(q_sum, axis=2, keepdims=True), axis=1, keepdims=True)  # (B,1,1)
    ssq = jnp.sum(jnp.sum(q_sq, axis=2, keepdims=True), axis=1, keepdims=True)

    mean = ssum * inv_cnt
    var = jnp.maximum(ssq * inv_cnt - mean * mean, 0.0)
    gamma = params_ref[1:2, :].reshape(1, 1, Cout)
    beta = params_ref[2:3, :].reshape(1, 1, Cout)
    scale = jax.lax.rsqrt(var + 1e-5) * gamma               # (B, 1, Cout)
    shift = beta - mean * scale                             # (B, 1, Cout)

    # hoisted broadcasts (JAX does not CSE broadcast_in_dim)
    scale_b = jnp.broadcast_to(scale, (B, Q, Cout))
    shift_b = jnp.broadcast_to(shift, (B, Q, Cout))

    # ---- affine + 2x2 max-pool (max over quadrants) + single ReLU -------------
    z0 = acc4[:, 0] * scale_b + shift_b
    z1 = acc4[:, 1] * scale_b + shift_b
    z2 = acc4[:, 2] * scale_b + shift_b
    z3 = acc4[:, 3] * scale_b + shift_b
    pooled = jnp.maximum(jnp.maximum(jnp.maximum(z0, z1), jnp.maximum(z2, z3)), 0.0)

    # one full-block store per grid step (bf16 by default -> half the writeback)
    out_ref[...] = pooled.astype(out_ref.dtype)


@functools.partial(jax.jit, static_argnames=("compute_dtype", "samples_per_block"))
def conv_block_forward(x_nchw, weight_oihw, bias, gamma, beta, *,
                       compute_dtype=jnp.bfloat16, samples_per_block=None):
    """ConvBlock forward. x_nchw: (N, Cin, H, W) -> (N, Cout, H//2, W//2)."""
    N, Cin, H, W = x_nchw.shape
    Cout, Cin_w, KH, KW = weight_oihw.shape
    if Cin_w != Cin:
        raise ValueError("weight / input channel mismatch")
    if (KH, KW) != (3, 3):
        raise ValueError("kernel is specialized to the module defaults: 3x3, stride 1, pad 1")
    if H % 2 or W % 2:
        raise ValueError("MaxPool2d(2, 2) path requires even H and W")
    # GroupNorm is applied because the chosen config enables it and in_channels > 1.
    Hp, Wp = H // 2, W // 2
    Q = Hp * Wp
    K = KH * KW * Cin
    itemsize = jnp.dtype(compute_dtype).itemsize

    def vmem_est(b):
        # double-buffered input/output blocks + in-kernel LHS/acc + weights (rough)
        in_b = b * (Hp + 1) * (Wp + 1) * 4 * Cin * itemsize
        out_b = b * Q * Cout * itemsize
        lhs_b = b * 4 * Q * K * itemsize
        acc_b = b * 4 * Q * Cout * 4
        w_b = K * Cout * itemsize
        return 2 * (in_b + out_b) + lhs_b + 2 * acc_b + w_b

    if samples_per_block is None:
        # Fit v5e's 16 MiB scoped-VMEM default with headroom; prefer an EVEN number
        # of grid steps (v7x has 2 TensorCores); on single-TC v5e/v6e a single big
        # step would also be fine (per-step overhead ~0.35 us) but even steps cost
        # nothing at these sizes.
        budget = 12 * 1024 * 1024
        divisors = [d for d in range(1, N + 1) if N % d == 0 and vmem_est(d) <= budget]
        if not divisors:
            divisors = [1]
        even_step = [d for d in divisors if (N // d) % 2 == 0]
        multi_step = [d for d in divisors if N // d >= 2]
        samples_per_block = max(even_step or multi_step or divisors)
    B = samples_per_block
    if N % B:
        raise ValueError("samples_per_block must divide the batch size")

    vmem_limit = int(min(48 * 1024 * 1024, max(32 * 1024 * 1024, 2 * vmem_est(B))))

    # ---- data prep: transpose + cast + pad + parity fold (pure layout work) ----
    x_nhwc = jnp.transpose(x_nchw, (0, 2, 3, 1)).astype(compute_dtype)
    xpad = jnp.pad(x_nhwc, ((0, 0), (1, 1), (1, 1), (0, 0)))
    # fold the 4 (row, col) parity planes into the trailing channel dim
    planes = [xpad[:, a::2, c::2, :] for a in range(2) for c in range(2)]
    x_fused = jnp.concatenate(planes, axis=-1)              # (N, Hp+1, Wp+1, 4*Cin)

    w_mat = (jnp.transpose(weight_oihw, (2, 3, 1, 0))        # (KH, KW, Cin, Cout)
             .reshape(K, Cout).astype(compute_dtype))
    params = jnp.stack([bias, gamma, beta], axis=0).astype(jnp.float32)   # (3, Cout)

    kernel = functools.partial(_conv_block_kernel, B=B, Hp=Hp, Wp=Wp,
                               Cin=Cin, Cout=Cout, KH=KH, KW=KW)

    out = pl.pallas_call(
        kernel,
        out_shape=jax.ShapeDtypeStruct((N, Q, Cout), compute_dtype),
        grid_spec=pltpu.PrefetchScalarGridSpec(
            num_scalar_prefetch=0,
            grid=(N // B,),
            in_specs=[
                pl.BlockSpec((B, Hp + 1, Wp + 1, 4 * Cin), lambda n: (n, 0, 0, 0)),
                pl.BlockSpec((K, Cout), lambda n: (0, 0)),
                pl.BlockSpec((3, Cout), lambda n: (0, 0)),
            ],
            out_specs=pl.BlockSpec((B, Q, Cout), lambda n: (n, 0, 0)),
        ),
        compiler_params=pltpu.CompilerParams(
            dimension_semantics=("parallel",),
            vmem_limit_bytes=vmem_limit),
    )(x_fused, w_mat, params)

    # back to NCHW (and back to the caller's dtype if compute_dtype is bf16)
    out = out.reshape(N, Hp, Wp, Cout)
    return jnp.transpose(out, (0, 3, 1, 2)).astype(x_nchw.dtype)


def _reference_forward(x, w, b, gamma, beta):
    """Plain-JAX reference of the same ConvBlock forward (NCHW)."""
    y = jax.lax.conv_general_dilated(
        x, w, window_strides=(1, 1), padding=((1, 1), (1, 1)),
        dimension_numbers=("NCHW", "OIHW", "NCHW"))
    y = y + b.reshape(1, -1, 1, 1)
    mean = y.mean(axis=(1, 2, 3), keepdims=True)
    var = ((y - mean) ** 2).mean(axis=(1, 2, 3), keepdims=True)
    y = (y - mean) * jax.lax.rsqrt(var + 1e-5)
    y = y * gamma.reshape(1, -1, 1, 1) + beta.reshape(1, -1, 1, 1)
    y = jnp.maximum(y, 0.0)
    N, C, H, W = y.shape
    y = y.reshape(N, C, H // 2, 2, W // 2, 2).max(axis=(3, 5))
    return y


if __name__ == "__main__":
    # Small deterministic shapes: batch=2, in_channels=4, out_channels=8, spatial=16.
    key = jax.random.PRNGKey(0)
    kx, kw, kb, kg, kbe = jax.random.split(key, 5)

    N, Cin, H, W = 2, 4, 16, 16
    Cout, KH, KW = 8, 3, 3

    x = jax.random.normal(kx, (N, Cin, H, W), dtype=jnp.float32)
    weight = jax.random.normal(kw, (Cout, Cin, KH, KW), dtype=jnp.float32) * 0.1
    bias = jax.random.normal(kb, (Cout,), dtype=jnp.float32) * 0.1
    gamma = 1.0 + 0.1 * jax.random.normal(kg, (Cout,), dtype=jnp.float32)
    beta = 0.1 * jax.random.normal(kbe, (Cout,), dtype=jnp.float32)

    ref = jax.block_until_ready(_reference_forward(x, weight, bias, gamma, beta))

    # f32 compute path: tight correctness check.
    out_f32 = jax.block_until_ready(
        conv_block_forward(x, weight, bias, gamma, beta, compute_dtype=jnp.float32))
    assert out_f32.shape == (N, Cout, H // 2, W // 2), out_f32.shape
    err_f32 = float(jnp.max(jnp.abs(out_f32 - ref)))
    assert err_f32 < 2e-2, f"f32 path max abs error too large: {err_f32}"

    # bf16 compute path (default): bf16 matmul inputs AND bf16 output writeback.
    out_bf16 = jax.block_until_ready(conv_block_forward(x, weight, bias, gamma, beta))
    assert out_bf16.shape == (N, Cout, H // 2, W // 2), out_bf16.shape
    err_bf16 = float(jnp.max(jnp.abs(out_bf16 - ref)))
    assert err_bf16 < 7.5e-2, f"bf16 path max abs error too large: {err_bf16}"

    print("KERNEL_OK")
</pallas_src>

<mosaic_0001>
module attributes {stable_mosaic.version = 11 : i64} {
  func.func @_conv_block_kernel(%arg0: i32, %arg1: memref<1x9x9x16xf32, #tpu.memory_space<vmem>>, %arg2: memref<36x8xf32, #tpu.memory_space<vmem>>, %arg3: memref<3x8xf32, #tpu.memory_space<vmem>>, %arg4: memref<1x64x8xf32, #tpu.memory_space<vmem>>) attributes {dimension_semantics = [#tpu.dimension_semantics<parallel>], iteration_bounds = array<i64: 2>, scalar_prefetch = 0 : i64, scratch_operands = 0 : i64, tpu.core_type = #tpu.core_type<tc>, window_params = [{transform_indices = @transform_0, window_bounds = array<i64: 1, 9, 9, 16>}, {pipeline_mode = #tpu.pipeline_mode<synchronous>, transform_indices = @transform_1, window_bounds = array<i64: 36, 8>}, {pipeline_mode = #tpu.pipeline_mode<synchronous>, transform_indices = @transform_2, window_bounds = array<i64: 3, 8>}, {transform_indices = @transform_3, window_bounds = array<i64: 1, 64, 8>}]} {
    %c0 = arith.constant 0 : index
    %c0_0 = arith.constant 0 : index
    %c0_1 = arith.constant 0 : index
    %c0_2 = arith.constant 0 : index
    %0 = vector.load %arg1[%c0, %c0_0, %c0_1, %c0_2] : memref<1x9x9x16xf32, #tpu.memory_space<vmem>>, vector<1x8x8x4xf32>
    %1 = vector.shape_cast %0 : vector<1x8x8x4xf32> to vector<1x64x4xf32>
    %c0_3 = arith.constant 0 : index
    %c0_4 = arith.constant 0 : index
    %c0_5 = arith.constant 0 : index
    %c4 = arith.constant 4 : index
    %2 = vector.load %arg1[%c0_3, %c0_4, %c0_5, %c4] : memref<1x9x9x16xf32, #tpu.memory_space<vmem>>, vector<1x8x8x4xf32>
    %3 = vector.shape_cast %2 : vector<1x8x8x4xf32> to vector<1x64x4xf32>
    %c0_6 = arith.constant 0 : index
    %c0_7 = arith.constant 0 : index
    %c1 = arith.constant 1 : index
    %c0_8 = arith.constant 0 : index
    %4 = vector.load %arg1[%c0_6, %c0_7, %c1, %c0_8] : memref<1x9x9x16xf32, #tpu.memory_space<vmem>>, vector<1x8x8x4xf32>
    %5 = vector.shape_cast %4 : vector<1x8x8x4xf32> to vector<1x64x4xf32>
    %c0_9 = arith.constant 0 : index
    %c0_10 = arith.constant 0 : index
    %c1_11 = arith.constant 1 : index
    %c4_12 = arith.constant 4 : index
    %6 = vector.load %arg1[%c0_9, %c0_10, %c1_11, %c4_12] : memref<1x9x9x16xf32, #tpu.memory_space<vmem>>, vector<1x8x8x4xf32>
    %7 = vector.shape_cast %6 : vector<1x8x8x4xf32> to vector<1x64x4xf32>
    %c0_13 = arith.constant 0 : index
    %c0_14 = arith.constant 0 : index
    %c0_15 = arith.constant 0 : index
    %c8 = arith.constant 8 : index
    %8 = vector.load %arg1[%c0_13, %c0_14, %c0_15, %c8] : memref<1x9x9x16xf32, #tpu.memory_space<vmem>>, vector<1x8x8x4xf32>
    %9 = vector.shape_cast %8 : vector<1x8x8x4xf32> to vector<1x64x4xf32>
    %c0_16 = arith.constant 0 : index
    %c0_17 = arith.constant 0 : index
    %c0_18 = arith.constant 0 : index
    %c12 = arith.constant 12 : index
    %10 = vector.load %arg1[%c0_16, %c0_17, %c0_18, %c12] : memref<1x9x9x16xf32, #tpu.memory_space<vmem>>, vector<1x8x8x4xf32>
    %11 = vector.shape_cast %10 : vector<1x8x8x4xf32> to vector<1x64x4xf32>
    %c0_19 = arith.constant 0 : index
    %c0_20 = arith.constant 0 : index
    %c1_21 = arith.constant 1 : index
    %c8_22 = arith.constant 8 : index
    %12 = vector.load %arg1[%c0_19, %c0_20, %c1_21, %c8_22] : memref<1x9x9x16xf32, #tpu.memory_space<vmem>>, vector<1x8x8x4xf32>
    %13 = vector.shape_cast %12 : vector<1x8x8x4xf32> to vector<1x64x4xf32>
    %c0_23 = arith.constant 0 : index
    %c0_24 = arith.constant 0 : index
    %c1_25 = arith.constant 1 : index
    %c12_26 = arith.constant 12 : index
    %14 = vector.load %arg1[%c0_23, %c0_24, %c1_25, %c12_26] : memref<1x9x9x16xf32, #tpu.memory_space<vmem>>, vector<1x8x8x4xf32>
    %15 = vector.shape_cast %14 : vector<1x8x8x4xf32> to vector<1x64x4xf32>
    %c0_27 = arith.constant 0 : index
    %c1_28 = arith.constant 1 : index
    %c0_29 = arith.constant 0 : index
    %c0_30 = arith.constant 0 : index
    %16 = vector.load %arg1[%c0_27, %c1_28, %c0_29, %c0_30] : memref<1x9x9x16xf32, #tpu.memory_space<vmem>>, vector<1x8x8x4xf32>
    %17 = vector.shape_cast %16 : vector<1x8x8x4xf32> to vector<1x64x4xf32>
    %c0_31 = arith.constant 0 : index
    %c1_32 = arith.constant 1 : index
    %c0_33 = arith.constant 0 : index
    %c4_34 = arith.constant 4 : index
    %18 = vector.load %arg1[%c0_31, %c1_32, %c0_33, %c4_34] : memref<1x9x9x16xf32, #tpu.memory_space<vmem>>, vector<1x8x8x4xf32>
    %19 = vector.shape_cast %18 : vector<1x8x8x4xf32> to vector<1x64x4xf32>
    %c0_35 = arith.constant 0 : index
    %c1_36 = arith.constant 1 : index
    %c1_37 = arith.constant 1 : index
    %c0_38 = arith.constant 0 : index
    %20 = vector.load %arg1[%c0_35, %c1_36, %c1_37, %c0_38] : memref<1x9x9x16xf32, #tpu.memory_space<vmem>>, vector<1x8x8x4xf32>
    %21 = vector.shape_cast %20 : vector<1x8x8x4xf32> to vector<1x64x4xf32>
    %c0_39 = arith.constant 0 : index
    %c1_40 = arith.constant 1 : index
    %c1_41 = arith.constant 1 : index
    %c4_42 = arith.constant 4 : index
    %22 = vector.load %arg1[%c0_39, %c1_40, %c1_41, %c4_42] : memref<1x9x9x16xf32, #tpu.memory_space<vmem>>, vector<1x8x8x4xf32>
    %23 = vector.shape_cast %22 : vector<1x8x8x4xf32> to vector<1x64x4xf32>
    %c0_43 = arith.constant 0 : index
    %c1_44 = arith.constant 1 : index
    %c0_45 = arith.constant 0 : index
    %c8_46 = arith.constant 8 : index
    %24 = vector.load %arg1[%c0_43, %c1_44, %c0_45, %c8_46] : memref<1x9x9x16xf32, #tpu.memory_space<vmem>>, vector<1x8x8x4xf32>
    %25 = vector.shape_cast %24 : vector<1x8x8x4xf32> to vector<1x64x4xf32>
    %c0_47 = arith.constant 0 : index
    %c1_48 = arith.constant 1 : index
    %c0_49 = arith.constant 0 : index
    %c12_50 = arith.constant 12 : index
    %26 = vector.load %arg1[%c0_47, %c1_48, %c0_49, %c12_50] : memref<1x9x9x16xf32, #tpu.memory_space<vmem>>, vector<1x8x8x4xf32>
    %27 = vector.shape_cast %26 : vector<1x8x8x4xf32> to vector<1x64x4xf32>
    %c0_51 = arith.constant 0 : index
    %c1_52 = arith.constant 1 : index
    %c1_53 = arith.constant 1 : index
    %c8_54 = arith.constant 8 : index
    %28 = vector.load %arg1[%c0_51, %c1_52, %c1_53, %c8_54] : memref<1x9x9x16xf32, #tpu.memory_space<vmem>>, vector<1x8x8x4xf32>
    %29 = vector.shape_cast %28 : vector<1x8x8x4xf32> to vector<1x64x4xf32>
    %c0_55 = arith.constant 0 : index
    %c1_56 = arith.constant 1 : index
    %c1_57 = arith.constant 1 : index
    %c12_58 = arith.constant 12 : index
    %30 = vector.load %arg1[%c0_55, %c1_56, %c1_57, %c12_58] : memref<1x9x9x16xf32, #tpu.memory_space<vmem>>, vector<1x8x8x4xf32>
    %31 = vector.shape_cast %30 : vector<1x8x8x4xf32> to vector<1x64x4xf32>
    %32 = tpu.concatenate %1, %3, %5, %9, %11, %13, %17, %19, %21 in 2 : vector<1x64x4xf32>, vector<1x64x4xf32>, vector<1x64x4xf32>, vector<1x64x4xf32>, vector<1x64x4xf32>, vector<1x64x4xf32>, vector<1x64x4xf32>, vector<1x64x4xf32>, vector<1x64x4xf32> -> vector<1x64x36xf32>
    %33 = tpu.concatenate %3, %5, %7, %11, %13, %15, %19, %21, %23 in 2 : vector<1x64x4xf32>, vector<1x64x4xf32>, vector<1x64x4xf32>, vector<1x64x4xf32>, vector<1x64x4xf32>, vector<1x64x4xf32>, vector<1x64x4xf32>, vector<1x64x4xf32>, vector<1x64x4xf32> -> vector<1x64x36xf32>
    %34 = tpu.concatenate %9, %11, %13, %17, %19, %21, %25, %27, %29 in 2 : vector<1x64x4xf32>, vector<1x64x4xf32>, vector<1x64x4xf32>, vector<1x64x4xf32>, vector<1x64x4xf32>, vector<1x64x4xf32>, vector<1x64x4xf32>, vector<1x64x4xf32>, vector<1x64x4xf32> -> vector<1x64x36xf32>
    %35 = tpu.concatenate %11, %13, %15, %19, %21, %23, %27, %29, %31 in 2 : vector<1x64x4xf32>, vector<1x64x4xf32>, vector<1x64x4xf32>, vector<1x64x4xf32>, vector<1x64x4xf32>, vector<1x64x4xf32>, vector<1x64x4xf32>, vector<1x64x4xf32>, vector<1x64x4xf32> -> vector<1x64x36xf32>
    %36 = tpu.concatenate %32, %33, %34, %35 in 1 : vector<1x64x36xf32>, vector<1x64x36xf32>, vector<1x64x36xf32>, vector<1x64x36xf32> -> vector<1x256x36xf32>
    %37 = vector.shape_cast %36 : vector<1x256x36xf32> to vector<256x36xf32>
    %c0_59 = arith.constant 0 : index
    %c0_60 = arith.constant 0 : index
    %38 = vector.load %arg2[%c0_59, %c0_60] : memref<36x8xf32, #tpu.memory_space<vmem>>, vector<36x8xf32>
    %cst = arith.constant dense<0.000000e+00> : vector<256x8xf32>
    %39 = tpu.matmul %37, %38, %cst {dimension_numbers = #tpu.dot_dimension_numbers<[1], [0], [0], [1], [0, 0, 1, 1], [], []>} : vector<256x36xf32>, vector<36x8xf32>, vector<256x8xf32> -> vector<256x8xf32>
    %c0_61 = arith.constant 0 : index
    %c0_62 = arith.constant 0 : index
    %40 = vector.load %arg3[%c0_61, %c0_62] : memref<3x8xf32, #tpu.memory_space<vmem>>, vector<1x8xf32>
    %41 = vector.broadcast %40 : vector<1x8xf32> to vector<256x8xf32>
    %42 = arith.addf %39, %41 : vector<256x8xf32>
    %43 = vector.shape_cast %42 : vector<256x8xf32> to vector<1x4x64x8xf32>
    %44 = vector.extract_strided_slice %43 {offsets = [0, 0, 0, 0], sizes = [1, 1, 64, 8], strides = [1, 1, 1, 1]} : vector<1x4x64x8xf32> to vector<1x1x64x8xf32>
    %45 = vector.shape_cast %44 : vector<1x1x64x8xf32> to vector<1x64x8xf32>
    %46 = vector.extract_strided_slice %43 {offsets = [0, 1, 0, 0], sizes = [1, 1, 64, 8], strides = [1, 1, 1, 1]} : vector<1x4x64x8xf32> to vector<1x1x64x8xf32>
    %47 = vector.shape_cast %46 : vector<1x1x64x8xf32> to vector<1x64x8xf32>
    %48 = arith.addf %45, %47 : vector<1x64x8xf32>
    %49 = vector.extract_strided_slice %43 {offsets = [0, 2, 0, 0], sizes = [1, 1, 64, 8], strides = [1, 1, 1, 1]} : vector<1x4x64x8xf32> to vector<1x1x64x8xf32>
    %50 = vector.shape_cast %49 : vector<1x1x64x8xf32> to vector<1x64x8xf32>
    %51 = arith.addf %48, %50 : vector<1x64x8xf32>
    %52 = vector.extract_strided_slice %43 {offsets = [0, 3, 0, 0], sizes = [1, 1, 64, 8], strides = [1, 1, 1, 1]} : vector<1x4x64x8xf32> to vector<1x1x64x8xf32>
    %53 = vector.shape_cast %52 : vector<1x1x64x8xf32> to vector<1x64x8xf32>
    %54 = arith.addf %51, %53 : vector<1x64x8xf32>
    %55 = vector.extract_strided_slice %43 {offsets = [0, 0, 0, 0], sizes = [1, 1, 64, 8], strides = [1, 1, 1, 1]} : vector<1x4x64x8xf32> to vector<1x1x64x8xf32>
    %56 = vector.shape_cast %55 : vector<1x1x64x8xf32> to vector<1x64x8xf32>
    %57 = vector.extract_strided_slice %43 {offsets = [0, 0, 0, 0], sizes = [1, 1, 64, 8], strides = [1, 1, 1, 1]} : vector<1x4x64x8xf32> to vector<1x1x64x8xf32>
    %58 = vector.shape_cast %57 : vector<1x1x64x8xf32> to vector<1x64x8xf32>
    %59 = arith.mulf %56, %58 : vector<1x64x8xf32>
    %60 = vector.extract_strided_slice %43 {offsets = [0, 1, 0, 0], sizes = [1, 1, 64, 8], strides = [1, 1, 1, 1]} : vector<1x4x64x8xf32> to vector<1x1x64x8xf32>
    %61 = vector.shape_cast %60 : vector<1x1x64x8xf32> to vector<1x64x8xf32>
    %62 = vector.extract_strided_slice %43 {offsets = [0, 1, 0, 0], sizes = [1, 1, 64, 8], strides = [1, 1, 1, 1]} : vector<1x4x64x8xf32> to vector<1x1x64x8xf32>
    %63 = vector.shape_cast %62 : vector<1x1x64x8xf32> to vector<1x64x8xf32>
    %64 = arith.mulf %61, %63 : vector<1x64x8xf32>
    %65 = arith.addf %59, %64 : vector<1x64x8xf32>
    %66 = vector.extract_strided_slice %43 {offsets = [0, 2, 0, 0], sizes = [1, 1, 64, 8], strides = [1, 1, 1, 1]} : vector<1x4x64x8xf32> to vector<1x1x64x8xf32>
    %67 = vector.shape_cast %66 : vector<1x1x64x8xf32> to vector<1x64x8xf32>
    %68 = vector.extract_strided_slice %43 {offsets = [0, 2, 0, 0], sizes = [1, 1, 64, 8], strides = [1, 1, 1, 1]} : vector<1x4x64x8xf32> to vector<1x1x64x8xf32>
    %69 = vector.shape_cast %68 : vector<1x1x64x8xf32> to vector<1x64x8xf32>
    %70 = arith.mulf %67, %69 : vector<1x64x8xf32>
    %71 = arith.addf %65, %70 : vector<1x64x8xf32>
    %72 = vector.extract_strided_slice %43 {offsets = [0, 3, 0, 0], sizes = [1, 1, 64, 8], strides = [1, 1, 1, 1]} : vector<1x4x64x8xf32> to vector<1x1x64x8xf32>
    %73 = vector.shape_cast %72 : vector<1x1x64x8xf32> to vector<1x64x8xf32>
    %74 = vector.extract_strided_slice %43 {offsets = [0, 3, 0, 0], sizes = [1, 1, 64, 8], strides = [1, 1, 1, 1]} : vector<1x4x64x8xf32> to vector<1x1x64x8xf32>
    %75 = vector.shape_cast %74 : vector<1x1x64x8xf32> to vector<1x64x8xf32>
    %76 = arith.mulf %73, %75 : vector<1x64x8xf32>
    %77 = arith.addf %71, %76 : vector<1x64x8xf32>
    %cst_63 = arith.constant dense<0.000000e+00> : vector<1x64xf32>
    %78 = vector.multi_reduction <add>, %54, %cst_63 [2] : vector<1x64x8xf32> to vector<1x64xf32>
    %79 = vector.shape_cast %78 : vector<1x64xf32> to vector<1x64x1xf32>
    %cst_64 = arith.constant dense<0.000000e+00> : vector<1x1xf32>
    %80 = vector.multi_reduction <add>, %79, %cst_64 [1] : vector<1x64x1xf32> to vector<1x1xf32>
    %81 = vector.shape_cast %80 : vector<1x1xf32> to vector<1x1x1xf32>
    %cst_65 = arith.constant dense<0.000000e+00> : vector<1x64xf32>
    %82 = vector.multi_reduction <add>, %77, %cst_65 [2] : vector<1x64x8xf32> to vector<1x64xf32>
    %83 = vector.shape_cast %82 : vector<1x64xf32> to vector<1x64x1xf32>
    %cst_66 = arith.constant dense<0.000000e+00> : vector<1x1xf32>
    %84 = vector.multi_reduction <add>, %83, %cst_66 [1] : vector<1x64x1xf32> to vector<1x1xf32>
    %85 = vector.shape_cast %84 : vector<1x1xf32> to vector<1x1x1xf32>
    %cst_67 = arith.constant 4.8828125E-4 : f32
    %86 = vector.broadcast %cst_67 : f32 to vector<1x1x1xf32>
    %87 = arith.mulf %81, %86 : vector<1x1x1xf32>
    %cst_68 = arith.constant 4.8828125E-4 : f32
    %88 = vector.broadcast %cst_68 : f32 to vector<1x1x1xf32>
    %89 = arith.mulf %85, %88 : vector<1x1x1xf32>
    %90 = arith.mulf %87, %87 : vector<1x1x1xf32>
    %91 = arith.subf %89, %90 : vector<1x1x1xf32>
    %cst_69 = arith.constant 0.000000e+00 : f32
    %92 = vector.broadcast %cst_69 : f32 to vector<1x1x1xf32>
    %93 = arith.maximumf %91, %92 : vector<1x1x1xf32>
    %c1_70 = arith.constant 1 : index
    %c0_71 = arith.constant 0 : index
    %94 = vector.load %arg3[%c1_70, %c0_71] : memref<3x8xf32, #tpu.memory_space<vmem>>, vector<1x8xf32>
    %95 = vector.shape_cast %94 : vector<1x8xf32> to vector<1x1x8xf32>
    %c2 = arith.constant 2 : index
    %c0_72 = arith.constant 0 : index
    %96 = vector.load %arg3[%c2, %c0_72] : memref<3x8xf32, #tpu.memory_space<vmem>>, vector<1x8xf32>
    %97 = vector.shape_cast %96 : vector<1x8xf32> to vector<1x1x8xf32>
    %cst_73 = arith.constant 9.99999974E-6 : f32
    %98 = vector.broadcast %cst_73 : f32 to vector<1x1x1xf32>
    %99 = arith.addf %93, %98 : vector<1x1x1xf32>
    %100 = math.rsqrt %99 : vector<1x1x1xf32>
    %101 = vector.broadcast %100 : vector<1x1x1xf32> to vector<1x1x8xf32>
    %102 = arith.mulf %101, %95 : vector<1x1x8xf32>
    %103 = vector.broadcast %87 : vector<1x1x1xf32> to vector<1x1x8xf32>
    %104 = arith.mulf %103, %102 : vector<1x1x8xf32>
    %105 = arith.subf %97, %104 : vector<1x1x8xf32>
    %106 = vector.shape_cast %102 : vector<1x1x8xf32> to vector<1x1x8xf32>
    %107 = vector.broadcast %106 : vector<1x1x8xf32> to vector<1x64x8xf32>
    %108 = vector.shape_cast %105 : vector<1x1x8xf32> to vector<1x1x8xf32>
    %109 = vector.broadcast %108 : vector<1x1x8xf32> to vector<1x64x8xf32>
    %110 = vector.extract_strided_slice %43 {offsets = [0, 0, 0, 0], sizes = [1, 1, 64, 8], strides = [1, 1, 1, 1]} : vector<1x4x64x8xf32> to vector<1x1x64x8xf32>
    %111 = vector.shape_cast %110 : vector<1x1x64x8xf32> to vector<1x64x8xf32>
    %112 = arith.mulf %111, %107 : vector<1x64x8xf32>
    %113 = arith.addf %112, %109 : vector<1x64x8xf32>
    %114 = vector.extract_strided_slice %43 {offsets = [0, 1, 0, 0], sizes = [1, 1, 64, 8], strides = [1, 1, 1, 1]} : vector<1x4x64x8xf32> to vector<1x1x64x8xf32>
    %115 = vector.shape_cast %114 : vector<1x1x64x8xf32> to vector<1x64x8xf32>
    %116 = arith.mulf %115, %107 : vector<1x64x8xf32>
    %117 = arith.addf %116, %109 : vector<1x64x8xf32>
    %118 = vector.extract_strided_slice %43 {offsets = [0, 2, 0, 0], sizes = [1, 1, 64, 8], strides = [1, 1, 1, 1]} : vector<1x4x64x8xf32> to vector<1x1x64x8xf32>
    %119 = vector.shape_cast %118 : vector<1x1x64x8xf32> to vector<1x64x8xf32>
    %120 = arith.mulf %119, %107 : vector<1x64x8xf32>
    %121 = arith.addf %120, %109 : vector<1x64x8xf32>
    %122 = vector.extract_strided_slice %43 {offsets = [0, 3, 0, 0], sizes = [1, 1, 64, 8], strides = [1, 1, 1, 1]} : vector<1x4x64x8xf32> to vector<1x1x64x8xf32>
    %123 = vector.shape_cast %122 : vector<1x1x64x8xf32> to vector<1x64x8xf32>
    %124 = arith.mulf %123, %107 : vector<1x64x8xf32>
    %125 = arith.addf %124, %109 : vector<1x64x8xf32>
    %126 = arith.maximumf %113, %117 : vector<1x64x8xf32>
    %127 = arith.maximumf %121, %125 : vector<1x64x8xf32>
    %128 = arith.maximumf %126, %127 : vector<1x64x8xf32>
    %cst_74 = arith.constant 0.000000e+00 : f32
    %129 = vector.broadcast %cst_74 : f32 to vector<1x64x8xf32>
    %130 = arith.maximumf %128, %129 : vector<1x64x8xf32>
    %c0_75 = arith.constant 0 : index
    %c0_76 = arith.constant 0 : index
    %c0_77 = arith.constant 0 : index
    %131 = vector.load %arg4[%c0_75, %c0_76, %c0_77] : memref<1x64x8xf32, #tpu.memory_space<vmem>>, vector<1x64x8xf32>
    tpu.vector_store %arg4[%c0_75, %c0_76, %c0_77], %130 {strides = array<i32>} : memref<1x64x8xf32, #tpu.memory_space<vmem>>, vector<1x64x8xf32>,
    return
  }
  func.func @transform_0(%arg0: i32) -> (i32, i32, i32, i32) {
    %c0_i32 = arith.constant 0 : i32
    %c0_i32_0 = arith.constant 0 : i32
    %c0_i32_1 = arith.constant 0 : i32
    %c0_i32_2 = arith.constant 0 : i32
    return %arg0, %c0_i32, %c0_i32_0, %c0_i32_1 : i32, i32, i32, i32
  }
  func.func @transform_1(%arg0: i32) -> (i32, i32) {
    %c0_i32 = arith.constant 0 : i32
    %c0_i32_0 = arith.constant 0 : i32
    %c0_i32_1 = arith.constant 0 : i32
    return %c0_i32, %c0_i32_0 : i32, i32
  }
  func.func @transform_2(%arg0: i32) -> (i32, i32) {
    %c0_i32 = arith.constant 0 : i32
    %c0_i32_0 = arith.constant 0 : i32
    %c0_i32_1 = arith.constant 0 : i32
    return %c0_i32, %c0_i32_0 : i32, i32
  }
  func.func @transform_3(%arg0: i32) -> (i32, i32, i32) {
    %c0_i32 = arith.constant 0 : i32
    %c0_i32_0 = arith.constant 0 : i32
    %c0_i32_1 = arith.constant 0 : i32
    return %arg0, %c0_i32, %c0_i32_0 : i32, i32, i32
  }
}

</mosaic_0001>

<bundles_post_ra>
// kernel: conv_block_forward.1
= control target key start
LH: loop header
LB: loop body
LE: loop exit
PB: predicated region body
PF: predicated region fallthrough
CT: control target
= control target key end

     0   :  { %s1816_s12 = smov 0   ;;  %s3018_s0 = inlined_call_operand.vmem [shape: f32[2,9,9,16], index: 0, kind: input, shape index: {}]   ;;  %s3019_s1 = inlined_call_operand.vmem [shape: f32[36,8], index: 1, kind: input, shape index: {}]   ;;  %s3020_s2 = inlined_call_operand.vmem [shape: f32[3,8], index: 2, kind: input, shape index: {}]   ;;  %s3021_s3 = inlined_call_operand.vmem [shape: f32[2,64,8], index: 3, kind: output, shape index: {}]  }
   0x1 LB: > { %s1585_s13 = sadd.s32 4294967295, %s1783_s12   ;;  %p1589_p0 = scmp.ge.s32.totalorder %s1783_s12, 1  ;;  %s1783_s12 = sphi %s1816_s12, %s13_s12  }
   0x2   : > { %p137_p1 = scmp.lt.s32.totalorder %s1783_s12, 3 }
   0x4   : > { %p138_p2 = pnand %p1589_p0, %p137_p1 }
   0x5   : > { %p161_p3 = scmp.lt.s32.totalorder (!%p138_p2), %s1585_s13, 1  ;;  %s1785_s18 = smov (!%p138_p2), 8   ;;  %v916_v5 = vld [vmem:[%s3019_s1] sm:$0xff] (!%p138_p2)  ;;  %v917_v6 = vld [vmem:[%s3019_s1 + $0x8] sm:$0xff] (!%p138_p2)  ;;  %v918_v9 = vld [vmem:[%s3019_s1 + $0x10] sm:$0xff] (!%p138_p2)  ;;  %vm1023_vm0 = vcmask (!%p138_p2), 1043456  }
   0x6   : > { %141 = sbr.rel (%p138_p2) target bundleno = 855 (0x357), region = 32  ;;  %s1786_s19 = smov (!%p138_p2), 4   ;;  %v1741_v7 = vpack.c.bf16 (!%p138_p2), %v917_v6, %v916_v5  ;;  %v919_v10 = vld [vmem:[%s3019_s1 + $0x18] sm:$0xff] (!%p138_p2)  ;;  %v920_v13 = vld [vmem:[%s3019_s1 + $0x20] sm:$0xf] (!%p138_p2)  ;;  %vm357_vm1 = vcmask (!%p138_p2), 64512  }
   0x7   : > { %s1787_s20 = smov (!%p138_p2), 12   ;;  %s1788_s25 = smov (!%p138_p2), 24   ;;  %v1745_v12 = vpack.c.bf16 (!%p138_p2), %v919_v10, %v918_v9  ;;  %vm366_vm2 = vcmask (!%p138_p2), 97280   ;;  %vm375_vm3 = vcmask (!%p138_p2), 130048   ;;  %vm384_vm4 = vcmask (!%p138_p2), 162816  }
   0x8   : > { %1742 = vmatprep.subr.bf16.mxu0 (!%p138_p2), %v1741_v7  ;;  %1749 = vmatprep.subr.bf16.mxu1 (!%p138_p2), %v1741_v7  ;;  %s1789_s26 = smov (!%p138_p2), 120   ;;  %s1790_s6 = smov (!%p138_p2), 32   ;;  %vm393_vm5 = vcmask (!%p138_p2), 195584   ;;  %vm402_vm6 = vcmask (!%p138_p2), 228352   ;;  %vm411_vm7 = vcmask (!%p138_p2), 261120   ;;  %vm926_vm8 = vcmask (!%p138_p2), 293888  }
   0x9   : > { %1744 = vmatpush3.bf16.msra.mxu0 (!%p138_p2), %v1741_v7  ;;  %1752 = vmatpush3.bf16.msra.mxu1 (!%p138_p2), %v1741_v7  ;;  %s1791_s7 = smov (!%p138_p2), 20   ;;  %s1792_s8 = smov (!%p138_p2), 16   ;;  %vm356_vm9 = vcmask (!%p138_p2), 31744  }
   0xa   : > { %1746 = vmatprep.subr.bf16.mxu0 (!%p138_p2), %v1745_v12  ;;  %1750 = vmatprep.subr.bf16.mxu1 (!%p138_p2), %v1745_v12  ;;  %s1793_s9 = smov (!%p138_p2), 124   ;;  %s1794_s10 = smov (!%p138_p2), 116  }
   0xb   : > { %s1795_s11 = smov (!%p138_p2), 28  }
   0xd   : > { %s3023_s13 = smov (!%p161_p3, %s1585_s13), 1  ;;  %1748 = vmatpush3.bf16.msra.mxu0 %v1745_v12  ;;  %1753 = vmatpush3.bf16.msra.mxu1 %v1745_v12 }
   0xe   : > { %s1755_s14 = smul.u32 144, %s3023_s13  ;;  %1691 = vmatprep.subr.msk.mxu0 %vm1023_vm0, %v920_v13  ;;  %1751 = vmatprep.subr.msk.mxu1 %vm1023_vm0, %v920_v13 }
  0x10   : > { %s1830_s17 = scalar_lea.vmem %s3018_s0, %s1755_s14 }
  0x11   : > { %v1833_v0 = vld [vmem:[%s1830_s17 + $0x1] sm:$0xff]  ;;  %v1843_v2 = vld [vmem:[%s1830_s17 + $0x11] sm:$0xff]  ;;  %1692 = vmatpush3.msk.msra.mxu0 %vm1023_vm0, %v920_v13  ;;  %1754 = vmatpush3.msk.msra.mxu1 %vm1023_vm0, %v920_v13 }
  0x12   : > { %v1836_v1 = vld [vmem:[%s1830_s17] sm:$0xff]  ;;  %212 = vrot.lane.b32.xlu0 %v1833_v0, %s1785_s18  ;;  %v1846_v3 = vld [vmem:[%s1830_s17 + $0x10] sm:$0xff] }
  0x13   : > { %244 = vrot.lane.b32.xlu1 %v1836_v1, %s1786_s19  ;;  %v1853_v4 = vld [vmem:[%s1830_s17 + $0x21] sm:$0xff]  ;;  %v1870_v8 = vld [vmem:[%s1830_s17 + $0x31] sm:$0xff] }
  0x14   : > { %v1883_v11 = vld [vmem:[%s1830_s17 + $0x20] sm:$0xff]  ;;  %v1897_v14 = vld [vmem:[%s1830_s17 + $0x30] sm:$0xff] }
  0x15   : > { %v1912_v15 = vld [vmem:[%s1830_s17 + $0x41] sm:$0xff]  ;;  %v1927_v16 = vld [vmem:[%s1830_s17 + $0x51] sm:$0xff] }
  0x16   : > { %214 = vrot.lane.b32.xlu0 %v1843_v2, %s1785_s18  ;;  %v1930_v17 = vld [vmem:[%s1830_s17 + $0x40] sm:$0xff]  ;;  %v1945_v18 = vld [vmem:[%s1830_s17 + $0x50] sm:$0xff] }
  0x17   : > { %246 = vrot.lane.b32.xlu1 %v1846_v3, %s1786_s19  ;;  %v1964_v19 = vld [vmem:[%s1830_s17 + $0x61] sm:$0xff]  ;;  %v1979_v20 = vld [vmem:[%s1830_s17 + $0x71] sm:$0xff] }
  0x18   : > { %v1982_v21 = vld [vmem:[%s1830_s17 + $0x60] sm:$0xff]  ;;  %v1997_v22 = vld [vmem:[%s1830_s17 + $0x70] sm:$0xff] }
  0x19   : > { %v2045_v34 = vld [vmem:[%s1830_s17 + $0x80] sm:$0xff] }
  0x1a   : > { %268 = vrot.lane.b32.xlu0 %v1833_v0, %s1787_s20  ;;  %v2088_v54 = vld [vmem:[%s1830_s17 + $0x81] sm:$0xff] }
  0x1b   : > { %216 = vrot.lane.b32.xlu1 %v1853_v4, %s1785_s18 }
  0x1e   : > { %270 = vrot.lane.b32.xlu0 %v1843_v2, %s1787_s20 }
  0x1f   : > { %300 = vrot.lane.b32.xlu1 %v1846_v3, %s1788_s25 }
  0x22   : > { %580 = vrot.lane.b32.xlu0 %v1836_v1, %s1789_s26 }
  0x23   : > { %218 = vrot.lane.b32.xlu1 %v1870_v8, %s1785_s18 }
  0x26   : > { %248 = vrot.lane.b32.xlu0 %v1883_v11, %s1786_s19 }
  0x27   : > { %302 = vrot.lane.b32.xlu1 %v1883_v11, %s1788_s25 }
  0x2a   : > { %582 = vrot.lane.b32.xlu0 %v1846_v3, %s1789_s26 }
  0x2b   : > { %604 = vrot.lane.b32.xlu1 %v1846_v3, %s1787_s20 }
  0x2e   : > { %250 = vrot.lane.b32.xlu0 %v1897_v14, %s1786_s19 }
  0x2f   : > { %332 = vrot.lane.b32.xlu1 %v1843_v2, %s1790_s6 }
  0x32   : > { %606 = vrot.lane.b32.xlu0 %v1883_v11, %s1787_s20 }
  0x33   : > { %272 = vrot.lane.b32.xlu1 %v1853_v4, %s1787_s20 }
  0x36   : > { %334 = vrot.lane.b32.xlu0 %v1853_v4, %s1790_s6 }
  0x37   : > { %628 = vrot.lane.b32.xlu1 %v1843_v2, %s1791_s7 }
  0x3a   : > { %220 = vrot.lane.b32.xlu0 %v1912_v15, %s1785_s18 }
  0x3b   : > { %274 = vrot.lane.b32.xlu1 %v1870_v8, %s1787_s20 }
  0x3e   : > { %304 = vrot.lane.b32.xlu0 %v1897_v14, %s1788_s25 }
  0x3f   : > { %584 = vrot.lane.b32.xlu1 %v1883_v11, %s1789_s26 }
  0x42   : > { %630 = vrot.lane.b32.xlu0 %v1853_v4, %s1791_s7 }
  0x43   : > { %652 = vrot.lane.b32.xlu1 %v1846_v3, %s1792_s8 }
  0x46   : > { %222 = vrot.lane.b32.xlu0 %v1927_v16, %s1785_s18 }
  0x47   : > { %252 = vrot.lane.b32.xlu1 %v1930_v17, %s1786_s19 }
  0x4a   : > { %306 = vrot.lane.b32.xlu0 %v1930_v17, %s1788_s25 }
  0x4b   : > { %586 = vrot.lane.b32.xlu1 %v1897_v14, %s1789_s26 }
  0x4e   : > { %608 = vrot.lane.b32.xlu0 %v1897_v14, %s1787_s20 }
  0x4f   : > { %654 = vrot.lane.b32.xlu1 %v1883_v11, %s1792_s8 }
  0x52   : > { %254 = vrot.lane.b32.xlu0 %v1945_v18, %s1786_s19 }
  0x53   : > { %336 = vrot.lane.b32.xlu1 %v1870_v8, %s1790_s6 }
  0x56   : > { %610 = vrot.lane.b32.xlu0 %v1930_v17, %s1787_s20 }
  0x57   : > { %676 = vrot.lane.b32.xlu1 %v1843_v2, %s1788_s25 }
  0x5a   : > { %276 = vrot.lane.b32.xlu0 %v1912_v15, %s1787_s20 }
  0x5b   : > { %338 = vrot.lane.b32.xlu1 %v1912_v15, %s1790_s6 }
  0x5e   : > { %632 = vrot.lane.b32.xlu0 %v1870_v8, %s1791_s7 }
  0x5f   : > { %678 = vrot.lane.b32.xlu1 %v1853_v4, %s1788_s25 }
  0x62   : > { %224 = vrot.lane.b32.xlu0 %v1964_v19, %s1785_s18 }
  0x63   : > { %278 = vrot.lane.b32.xlu1 %v1927_v16, %s1787_s20 }
  0x66   : > { %308 = vrot.lane.b32.xlu0 %v1945_v18, %s1788_s25 }
  0x67   : > { %588 = vrot.lane.b32.xlu1 %v1930_v17, %s1789_s26 }
  0x6a   : > { %634 = vrot.lane.b32.xlu0 %v1912_v15, %s1791_s7 }
  0x6b   : > { %656 = vrot.lane.b32.xlu1 %v1897_v14, %s1792_s8 }
  0x6e   : > { %226 = vrot.lane.b32.xlu0 %v1979_v20, %s1785_s18 }
  0x6f   : > { %256 = vrot.lane.b32.xlu1 %v1982_v21, %s1786_s19 }
  0x72   : > { %310 = vrot.lane.b32.xlu0 %v1982_v21, %s1788_s25 }
  0x73   : > { %590 = vrot.lane.b32.xlu1 %v1945_v18, %s1789_s26 }
  0x76   : > { %612 = vrot.lane.b32.xlu0 %v1945_v18, %s1787_s20 }
  0x77   : > { %658 = vrot.lane.b32.xlu1 %v1930_v17, %s1792_s8 }
  0x7a   : > { %258 = vrot.lane.b32.xlu0 %v1997_v22, %s1786_s19 }
  0x7b   : > { %340 = vrot.lane.b32.xlu1 %v1927_v16, %s1790_s6 }
  0x7e   : > { %614 = vrot.lane.b32.xlu0 %v1982_v21, %s1787_s20 }
  0x7f   : > { %680 = vrot.lane.b32.xlu1 %v1870_v8, %s1788_s25 }
  0x82   : > { %280 = vrot.lane.b32.xlu0 %v1964_v19, %s1787_s20 }
  0x83   : > { %342 = vrot.lane.b32.xlu1 %v1964_v19, %s1790_s6 }
  0x84   : > { %v2011_v23 = vpop.permute.xlu0 %212 }
  0x85   : > { %v245_v24 = vpop.permute.xlu1 %244  ;;  %v358_v33 = vsel %vm357_vm1, %v1836_v1, %v2011_v23 }
  0x86   : > { %420 = vrot.lane.b32.xlu0 %v1836_v1, %s1793_s9  ;;  %v367_v35 = vsel %vm366_vm2, %v358_v33, %v245_v24 }
  0x87   : > { %444 = vrot.lane.b32.xlu1 %v1833_v0, %s1786_s19  ;;  %v376_v38 = vsel %vm375_vm3, %v367_v35, %v245_v24 }
  0x88   : > { %v2017_v25 = vpop.permute.xlu0 %214 }
  0x89   : > { %v247_v26 = vpop.permute.xlu1 %246  ;;  %v359_v42 = vsel %vm357_vm1, %v1846_v3, %v2017_v25 }
  0x8a   : > { %636 = vrot.lane.b32.xlu0 %v1927_v16, %s1791_s7  ;;  %v368_v44 = vsel %vm366_vm2, %v359_v42, %v247_v26 }
  0x8b   : > { %682 = vrot.lane.b32.xlu1 %v1912_v15, %s1788_s25  ;;  %v377_v49 = vsel %vm375_vm3, %v368_v44, %v247_v26 }
  0x8c   : > { %v269_v27 = vpop.permute.xlu0 %268 }
  0x8d   : > { %v2023_v28 = vpop.permute.xlu1 %216  ;;  %v385_v39 = vsel %vm384_vm4, %v376_v38, %v269_v27 }
  0x8e   : > { %282 = vrot.lane.b32.xlu0 %v1979_v20, %s1787_s20  ;;  %v360_v9 = vsel %vm357_vm1, %v1883_v11, %v2023_v28 }
  0x8f   : > { %312 = vrot.lane.b32.xlu1 %v1997_v22, %s1788_s25 }
  0x90   : > { %v271_v29 = vpop.permute.xlu0 %270 }
  0x91   : > { %v301_v30 = vpop.permute.xlu1 %300  ;;  %v386_v50 = vsel %vm384_vm4, %v377_v49, %v271_v29 }
  0x92   : > { %422 = vrot.lane.b32.xlu0 %v1846_v3, %s1793_s9  ;;  %v394_v43 = vsel %vm393_vm5, %v385_v39, %v301_v30 }
  0x93   : > { %446 = vrot.lane.b32.xlu1 %v1843_v2, %s1786_s19  ;;  %v403_v47 = vsel %vm402_vm6, %v394_v43, %v301_v30 }
  0x94   : > { %v2033_v31 = vpop.permute.xlu0 %580 }
  0x95   : > { %v2035_v32 = vpop.permute.xlu1 %218  ;;  %v700_v24 = vsel %vm357_vm1, %v2033_v31, %v1833_v0 }
  0x96   : > { %592 = vrot.lane.b32.xlu0 %v1982_v21, %s1789_s26  ;;  %v361_v31 = vsel %vm357_vm1, %v1897_v14, %v2035_v32 }
  0x97   : > { %638 = vrot.lane.b32.xlu1 %v1964_v19, %s1791_s7 }
  0x98   : > { %v2048_v36 = vpop.permute.xlu0 %248 }
  0x99   : > { %v303_v37 = vpop.permute.xlu1 %302  ;;  %v369_v10 = vsel %vm366_vm2, %v360_v9, %v2048_v36 }
  0x9a   : > { %660 = vrot.lane.b32.xlu0 %v1945_v18, %s1792_s8  ;;  %v395_v53 = vsel %vm393_vm5, %v386_v50, %v303_v37  ;;  %v378_v26 = vsel %vm375_vm3, %v369_v10, %v2048_v36 }
  0x9b   : > { %314 = vrot.lane.b32.xlu1 %v2045_v34, %s1788_s25  ;;  %v404_v55 = vsel %vm402_vm6, %v395_v53, %v303_v37 }
  0x9c   : > { %v2056_v40 = vpop.permute.xlu0 %582 }
  0x9d   : > { %v2058_v41 = vpop.permute.xlu1 %604 }
  0x9e   : > { %594 = vrot.lane.b32.xlu0 %v1997_v22, %s1789_s26  ;;  %v708_v27 = vsel %vm366_vm2, %v700_v24, %v2058_v41 }
  0x9f   : > { %616 = vrot.lane.b32.xlu1 %v1997_v22, %s1787_s20 }
  0xa0   : > { %v2069_v45 = vpop.permute.xlu0 %250 }
  0xa1   : > { %v333_v46 = vpop.permute.xlu1 %332  ;;  %v370_v36 = vsel %vm366_vm2, %v361_v31, %v2069_v45 }
  0xa2   : > { %v412_v48 = vsel %vm411_vm7, %v403_v47, %v333_v46  ;;  %662 = vrot.lane.b32.xlu0 %v1982_v21, %s1792_s8  ;;  %v701_v46 = vsel %vm357_vm1, %v2056_v40, %v1843_v2  ;;  %v379_v47 = vsel %vm375_vm3, %v370_v36, %v2069_v45 }
  0xa3   : > { %344 = vrot.lane.b32.xlu1 %v1979_v20, %s1790_s6  ;;  %1693 = vmatprep.mubr.msk.f32.mxu0 %vm926_vm8, %v412_v48 }
  0xa4   : > { %v2080_v51 = vpop.permute.xlu0 %606 }
  0xa5   : > { %v273_v52 = vpop.permute.xlu1 %272  ;;  %v709_v48 = vsel %vm366_vm2, %v701_v46, %v2080_v51 }
  0xa6   : > { %618 = vrot.lane.b32.xlu0 %v2045_v34, %s1787_s20  ;;  %v387_v29 = vsel %vm384_vm4, %v378_v26, %v273_v52  ;;  %v717_v40 = vsel %vm375_vm3, %v709_v48, %v2080_v51  ;;  %s1645_s20 = sshll.u32 %s3023_s13, 6 }
  0xa7   : > { %684 = vrot.lane.b32.xlu1 %v1927_v16, %s1788_s25  ;;  %s170_s23 = scalar_lea.vmem %s3021_s3, %s1645_s20 }
  0xa8   : > { %v335_v56 = vpop.permute.xlu0 %334 }
  0xa9   : > { %v2091_v57 = vpop.permute.xlu1 %628  ;;  %v413_v58 = vsel %vm411_vm7, %v404_v55, %v335_v56 }
  0xaa   : > { %346 = vrot.lane.b32.xlu0 %v2088_v54, %s1790_s6  ;;  %1694 = vmatmul.mubr.msk.f32.vlgmr.msra.gmra.mrb[0].mxu0 %vm926_vm8, %v413_v58 }
  0xab   : > { %424 = vrot.lane.b32.xlu1 %v1883_v11, %s1793_s9 }
  0xac   : > { %v2099_v59 = vpop.permute.xlu0 %220 }
  0xad   : > { %v275_v60 = vpop.permute.xlu1 %274 }
  0xae   : > { %448 = vrot.lane.b32.xlu0 %v1853_v4, %s1786_s19  ;;  %v388_v49 = vsel %vm384_vm4, %v379_v47, %v275_v60 }
  0xaf   : > { %640 = vrot.lane.b32.xlu1 %v1979_v20, %s1791_s7 }
  0xb0   : > { %v305_v61 = vpop.permute.xlu0 %304 }
  0xb1   : > { %v2105_v62 = vpop.permute.xlu1 %584  ;;  %v396_v35 = vsel %vm393_vm5, %v387_v29, %v305_v61 }
  0xb2   : > { %686 = vrot.lane.b32.xlu0 %v1964_v19, %s1788_s25  ;;  %v405_v37 = vsel %vm402_vm6, %v396_v35, %v305_v61 }
  0xb3   : > { %756 = vrot.lane.b32.xlu1 %v1836_v1, %s1794_s10 }
  0xb4   : > { %v2111_v63 = vpop.permute.xlu0 %630 }
  0xb5   : > { %v653_v5 = vpop.permute.xlu1 %652  ;;  %v725_v58 = vsel %vm384_vm4, %v717_v40, %v2111_v63 }
  0xb6   : > { %780 = vrot.lane.b32.xlu0 %v1833_v0, %s1793_s9  ;;  %v716_v0 = vsel %vm375_vm3, %v708_v27, %v2058_v41 }
  0xb7   : > { %426 = vrot.lane.b32.xlu1 %v1897_v14, %s1793_s9  ;;  %v724_v38 = vsel %vm384_vm4, %v716_v0, %v2091_v57 }
  0xb8   : > { %v2117_v6 = vpop.permute.xlu0 %222  ;;  %v732_v43 = vsel %vm393_vm5, %v724_v38, %v653_v5 }
  0xb9   : > { %v2119_v7 = vpop.permute.xlu1 %252  ;;  %v740_v53 = vsel %vm402_vm6, %v732_v43, %v653_v5 }
  0xba   : > { %450 = vrot.lane.b32.xlu0 %v1870_v8, %s1786_s19 }
  0xbb   : > { %468 = vrot.lane.b32.xlu1 %v1846_v3, %s1791_s7 }
  0xbc   : > { %v307_v12 = vpop.permute.xlu0 %306 }
  0xbd   : > { %v2130_v13 = vpop.permute.xlu1 %586  ;;  %v397_v55 = vsel %vm393_vm5, %v388_v49, %v307_v12 }
  0xbe   : > { %642 = vrot.lane.b32.xlu0 %v2088_v54, %s1791_s7  ;;  %v406_v45 = vsel %vm402_vm6, %v397_v55, %v307_v12 }
  0xbf   : > { %664 = vrot.lane.b32.xlu1 %v1997_v22, %s1792_s8 }
  0xc0   : > { %v2144_v30 = vpop.permute.xlu0 %608 }
  0xc1   : > { %v655_v33 = vpop.permute.xlu1 %654 }
  0xc2   : > { %758 = vrot.lane.b32.xlu0 %v1846_v3, %s1794_s10  ;;  %v733_v5 = vsel %vm393_vm5, %v725_v58, %v655_v33 }
  0xc3   : > { %782 = vrot.lane.b32.xlu1 %v1843_v2, %s1793_s9  ;;  %v741_v10 = vsel %vm402_vm6, %v733_v5, %v655_v33 }
  0xc4   : > { %v2161_v39 = vpop.permute.xlu0 %254 }
  0xc5   : > { %v337_v42 = vpop.permute.xlu1 %336 }
  0xc6   : > { %v414_v44 = vsel %vm411_vm7, %v405_v37, %v337_v42  ;;  %470 = vrot.lane.b32.xlu0 %v1883_v11, %s1791_s7  ;;  %v362_v37 = vsel %vm357_vm1, %v1930_v17, %v2099_v59 }
  0xc7   : > { %492 = vrot.lane.b32.xlu1 %v1843_v2, %s1795_s11  ;;  %1696 = vmatprep.mubr.msk.f32.mxu0 %vm926_vm8, %v414_v44  ;;  %v371_v38 = vsel %vm366_vm2, %v362_v37, %v2119_v7  ;;  %v702_v44 = vsel %vm357_vm1, %v2105_v62, %v1853_v4  ;;  %v363_v62 = vsel %vm357_vm1, %v1945_v18, %v2117_v6 }
  0xc8   : > { %v2178_v50 = vpop.permute.xlu0 %610  ;;  %v380_v46 = vsel %vm375_vm3, %v371_v38, %v2119_v7  ;;  %v710_v47 = vsel %vm366_vm2, %v702_v44, %v2144_v30  ;;  %v372_v7 = vsel %vm366_vm2, %v363_v62, %v2161_v39 }
  0xc9   : > { %v677_v52 = vpop.permute.xlu1 %676 }
  0xca   : > { %v748_v56 = vsel %vm411_vm7, %v740_v53, %v677_v52  ;;  %666 = vrot.lane.b32.xlu0 %v2045_v34, %s1792_s8 }
  0xcb   : > { %804 = vrot.lane.b32.xlu1 %v1846_v3, %s1785_s18  ;;  %1717 = vmatprep.mubr.msk.f32.mxu1 %vm926_vm8, %v748_v56 }
  0xcc   : > { %v277_v60 = vpop.permute.xlu0 %276 }
  0xcd   : > { %v339_v61 = vpop.permute.xlu1 %338  ;;  %v389_v48 = vsel %vm384_vm4, %v380_v46, %v277_v60 }
  0xce   : > { %v415_v9 = vsel %vm411_vm7, %v406_v45, %v339_v61  ;;  %494 = vrot.lane.b32.xlu0 %v1853_v4, %s1795_s11  ;;  %v381_v61 = vsel %vm375_vm3, %v372_v7, %v2161_v39  ;;  %v703_v39 = vsel %vm357_vm1, %v2130_v13, %v1870_v8 }
  0xcf   : > { %688 = vrot.lane.b32.xlu1 %v1979_v20, %s1788_s25  ;;  %1697 = vmatmul.mubr.msk.f32.gmra.mrb[2].mxu0 %vm926_vm8, %v415_v9 }
  0xd0   : > { %v2201_v12 = vpop.permute.xlu0 %632 }
  0xd1   : > { %v679_v24 = vpop.permute.xlu1 %678 }
  0xd2   : > { %v749_v26 = vsel %vm411_vm7, %v741_v10, %v679_v24  ;;  %806 = vrot.lane.b32.xlu0 %v1883_v11, %s1785_s18 }
  0xd3   : > { %828 = vrot.lane.b32.xlu1 %v1843_v2, %s1792_s8  ;;  %1718 = vmatmul.mubr.msk.f32.vlgmr.msra.gmra.mrb[0].mxu1 %vm926_vm8, %v749_v26 }
  0xd4   : > { %v2209_v27 = vpop.permute.xlu0 %224 }
  0xd5   : > { %v279_v29 = vpop.permute.xlu1 %278 }
  0xd6   : > { %428 = vrot.lane.b32.xlu0 %v1930_v17, %s1793_s9  ;;  %v390_v5 = vsel %vm384_vm4, %v381_v61, %v279_v29  ;;  %v711_v29 = vsel %vm366_vm2, %v703_v39, %v2178_v50 }
  0xd7   : > { %452 = vrot.lane.b32.xlu1 %v1912_v15, %s1786_s19  ;;  %v719_v13 = vsel %vm375_vm3, %v711_v29, %v2178_v50 }
  0xd8   : > { %v309_v33 = vpop.permute.xlu0 %308 }
  0xd9   : > { %v2215_v35 = vpop.permute.xlu1 %588  ;;  %v398_v53 = vsel %vm393_vm5, %v389_v48, %v309_v33 }
  0xda   : > { %690 = vrot.lane.b32.xlu0 %v2088_v54, %s1788_s25  ;;  %v407_v55 = vsel %vm402_vm6, %v398_v53, %v309_v33 }
  0xdb   : > { %760 = vrot.lane.b32.xlu1 %v1883_v11, %s1794_s10 }
  0xdc   : > { %v2221_v2 = vpop.permute.xlu0 %634 }
  0xdd   : > { %v657_v0 = vpop.permute.xlu1 %656  ;;  %v727_v46 = vsel %vm384_vm4, %v719_v13, %v2221_v2 }
  0xde   : > { %784 = vrot.lane.b32.xlu0 %v1853_v4, %s1793_s9 }
  0xdf   : > { %830 = vrot.lane.b32.xlu1 %v1853_v4, %s1792_s8  ;;  %v718_v4 = vsel %vm375_vm3, %v710_v47, %v2144_v30 }
  0xe0   : > { %v2227_v31 = vpop.permute.xlu0 %226  ;;  %v726_v56 = vsel %vm384_vm4, %v718_v4, %v2201_v12 }
  0xe1   : > { %v2229_v36 = vpop.permute.xlu1 %256  ;;  %v734_v58 = vsel %vm393_vm5, %v726_v56, %v657_v0 }
  0xe2   : > { %430 = vrot.lane.b32.xlu0 %v1945_v18, %s1793_s9  ;;  %v742_v9 = vsel %vm402_vm6, %v734_v58, %v657_v0 }
  0xe3   : > { %454 = vrot.lane.b32.xlu1 %v1927_v16, %s1786_s19 }
  0xe4   : > { %v311_v42 = vpop.permute.xlu0 %310 }
  0xe5   : > { %v2240_v43 = vpop.permute.xlu1 %590  ;;  %v399_v26 = vsel %vm393_vm5, %v390_v5, %v311_v42 }
  0xe6   : > { %472 = vrot.lane.b32.xlu0 %v1897_v14, %s1791_s7  ;;  %v408_v0 = vsel %vm402_vm6, %v399_v26, %v311_v42 }
  0xe7   : > { %762 = vrot.lane.b32.xlu1 %v1897_v14, %s1794_s10 }
  0xe8   : > { %v2254_v49 = vpop.permute.xlu0 %612 }
  0xe9   : > { %v659_v52 = vpop.permute.xlu1 %658 }
  0xea   : > { %786 = vrot.lane.b32.xlu0 %v1870_v8, %s1793_s9  ;;  %v735_v48 = vsel %vm393_vm5, %v727_v46, %v659_v52 }
  0xeb   : > { %474 = vrot.lane.b32.xlu1 %v1930_v17, %s1791_s7 }
  0xec   : > { %v2271_v40 = vpop.permute.xlu0 %258 }
  0xed   : > { %v341_v45 = vpop.permute.xlu1 %340 }
  0xee   : > { %v416_v60 = vsel %vm411_vm7, %v407_v55, %v341_v45  ;;  %496 = vrot.lane.b32.xlu0 %v1870_v8, %s1795_s11 }
  0xef   : > { %808 = vrot.lane.b32.xlu1 %v1897_v14, %s1785_s18  ;;  %1699 = vmatprep.mubr.msk.f32.mxu0 %vm926_vm8, %v416_v60  ;;  %v364_v60 = vsel %vm357_vm1, %v1982_v21, %v2209_v27 }
  0xf0   : > { %v2284_v10 = vpop.permute.xlu0 %614  ;;  %v373_v61 = vsel %vm366_vm2, %v364_v60, %v2229_v36 }
  0xf1   : > { %v681_v24 = vpop.permute.xlu1 %680  ;;  %v382_v26 = vsel %vm375_vm3, %v373_v61, %v2229_v36 }
  0xf2   : > { %v750_v33 = vsel %vm411_vm7, %v742_v9, %v681_v24  ;;  %498 = vrot.lane.b32.xlu0 %v1912_v15, %s1795_s11  ;;  %v704_v24 = vsel %vm357_vm1, %v2215_v35, %v1912_v15  ;;  %v365_v35 = vsel %vm357_vm1, %v1997_v22, %v2227_v31 }
  0xf3   : > { %810 = vrot.lane.b32.xlu1 %v1930_v17, %s1785_s18  ;;  %1720 = vmatprep.mubr.msk.f32.mxu1 %vm926_vm8, %v750_v33  ;;  %v712_v33 = vsel %vm366_vm2, %v704_v24, %v2254_v49  ;;  %v374_v36 = vsel %vm366_vm2, %v365_v35, %v2271_v40 }
  0xf4   : > { %v281_v37 = vpop.permute.xlu0 %280 }
  0xf5   : > { %v343_v38 = vpop.permute.xlu1 %342  ;;  %v391_v39 = vsel %vm384_vm4, %v382_v26, %v281_v37 }
  0xf6   : > { %v417_v44 = vsel %vm411_vm7, %v408_v0, %v343_v38  ;;  %832 = vrot.lane.b32.xlu0 %v1870_v8, %s1792_s8  ;;  %v743_v8 = vsel %vm402_vm6, %v735_v48, %v659_v52 }
  0xf7   : > { %432 = vrot.lane.b32.xlu1 %v1982_v21, %s1793_s9  ;;  %1700 = vmatmul.mubr.msk.f32.gmra.mrb[4].mxu0 %vm926_vm8, %v417_v44 }
  0xf8   : > { %v2309_v47 = vpop.permute.xlu0 %420 }
  0xf9   : > { %v2311_v42 = vpop.permute.xlu1 %444 }
  0xfa   : > { %456 = vrot.lane.b32.xlu0 %v1964_v19, %s1786_s19 }
  0xfb   : > { %764 = vrot.lane.b32.xlu1 %v1930_v17, %s1794_s10 }
  0xfc   : > { %v2319_v53 = vpop.permute.xlu0 %636 }
  0xfd   : > { %v683_v4 = vpop.permute.xlu1 %682 }
  0xfe   : > { %v751_v62 = vsel %vm411_vm7, %v743_v8, %v683_v4  ;;  %788 = vrot.lane.b32.xlu0 %v1912_v15, %s1793_s9  ;;  %v383_v4 = vsel %vm375_vm3, %v374_v36, %v2271_v40  ;;  %v705_v40 = vsel %vm357_vm1, %v2240_v43, %v1927_v16 }
  0xff   : > { %834 = vrot.lane.b32.xlu1 %v1912_v15, %s1792_s8  ;;  %1721 = vmatmul.mubr.msk.f32.gmra.mrb[2].mxu1 %vm926_vm8, %v751_v62  ;;  %v720_v15 = vsel %vm375_vm3, %v712_v33, %v2254_v49 }
 0x100   : > { %v283_v7 = vpop.permute.xlu0 %282  ;;  %v728_v44 = vsel %vm384_vm4, %v720_v15, %v2319_v53 }
 0x101   : > { %v313_v55 = vpop.permute.xlu1 %312  ;;  %v392_v62 = vsel %vm384_vm4, %v383_v4, %v283_v7  ;;  %v713_v7 = vsel %vm366_vm2, %v705_v40, %v2284_v10 }
 0x102   : > { %434 = vrot.lane.b32.xlu0 %v1997_v22, %s1793_s9  ;;  %v400_v38 = vsel %vm393_vm5, %v391_v39, %v313_v55 }
 0x103   : > { %458 = vrot.lane.b32.xlu1 %v1979_v20, %s1786_s19  ;;  %v409_v37 = vsel %vm402_vm6, %v400_v38, %v313_v55 }
 0x104   : > { %v2331_v52 = vpop.permute.xlu0 %422 }
 0x105   : > { %v2333_v56 = vpop.permute.xlu1 %446 }
 0x106   : > { %476 = vrot.lane.b32.xlu0 %v1945_v18, %s1791_s7 }
 0x107   : > { %766 = vrot.lane.b32.xlu1 %v1945_v18, %s1794_s10 }
 0x108   : > { %v2339_v45 = vpop.permute.xlu0 %592 }
 0x109   : > { %v2341_v58 = vpop.permute.xlu1 %638 }
 0x10a   : > { %790 = vrot.lane.b32.xlu0 %v1927_v16, %s1793_s9 }
 0x10b   : > { %478 = vrot.lane.b32.xlu1 %v1982_v21, %s1791_s7 }
 0x10c   : > { %v661_v5 = vpop.permute.xlu0 %660 }
 0x10d   : > { %v315_v9 = vpop.permute.xlu1 %314  ;;  %v736_v48 = vsel %vm393_vm5, %v728_v44, %v661_v5 }
 0x10e   : > { %500 = vrot.lane.b32.xlu0 %v1927_v16, %s1795_s11  ;;  %v744_v55 = vsel %vm402_vm6, %v736_v48, %v661_v5  ;;  %v401_v24 = vsel %vm393_vm5, %v392_v62, %v315_v9 }
 0x10f   : > { %812 = vrot.lane.b32.xlu1 %v1945_v18, %s1785_s18  ;;  %v410_v5 = vsel %vm402_vm6, %v401_v24, %v315_v9 }
 0x110   : > { %v2364_v29 = vpop.permute.xlu0 %594 }
 0x111   : > { %v2366_v0 = vpop.permute.xlu1 %616 }
 0x112   : > { %502 = vrot.lane.b32.xlu0 %v1964_v19, %s1795_s11 }
 0x113   : > { %814 = vrot.lane.b32.xlu1 %v1982_v21, %s1785_s18 }
 0x114   : > { %v663_v13 = vpop.permute.xlu0 %662 }
 0x115   : > { %v345_v46 = vpop.permute.xlu1 %344 }
 0x116   : > { %v418_v8 = vsel %vm411_vm7, %v409_v37, %v345_v46  ;;  %836 = vrot.lane.b32.xlu0 %v1927_v16, %s1792_s8  ;;  %v721_v16 = vsel %vm375_vm3, %v713_v7, %v2284_v10 }
 0x117   : > { %768 = vrot.lane.b32.xlu1 %v1982_v21, %s1794_s10  ;;  %1702 = vmatprep.mubr.msk.f32.mxu0 %vm926_vm8, %v418_v8  ;;  %v729_v43 = vsel %vm384_vm4, %v721_v16, %v2341_v58 }
 0x118   : > { %v2394_v60 = vpop.permute.xlu0 %618  ;;  %v737_v35 = vsel %vm393_vm5, %v729_v43, %v663_v13 }
 0x119   : > { %v685_v61 = vpop.permute.xlu1 %684  ;;  %v745_v36 = vsel %vm402_vm6, %v737_v35, %v663_v13  ;;  %v516_v13 = vsel %vm356_vm9, %v2309_v47, %v2311_v42  ;;  %v517_v47 = vsel %vm356_vm9, %v2331_v52, %v2333_v56 }
 0x11a   : > { %v752_v26 = vsel %vm411_vm7, %v744_v55, %v685_v61  ;;  %792 = vrot.lane.b32.xlu0 %v1964_v19, %s1793_s9  ;;  %v524_v55 = vsel %vm357_vm1, %v516_v13, %v2311_v42  ;;  %v525_v7 = vsel %vm357_vm1, %v517_v47, %v2333_v56 }
 0x11b   : > { %838 = vrot.lane.b32.xlu1 %v1964_v19, %s1792_s8  ;;  %1723 = vmatprep.mubr.msk.f32.mxu1 %vm926_vm8, %v752_v26  ;;  %v533_v16 = vsel %vm366_vm2, %v525_v7, %v1846_v3 }
 0x11c   : > { %v347_v33 = vpop.permute.xlu0 %346 }
 0x11d   : > { %v2409_v39 = vpop.permute.xlu1 %424  ;;  %v419_v38 = vsel %vm411_vm7, %v410_v5, %v347_v33 }
 0x11e   : > { %480 = vrot.lane.b32.xlu0 %v1997_v22, %s1791_s7  ;;  %1703 = vmatmul.mubr.msk.f32.gmra.mrb[6].mxu0 %vm926_vm8, %v419_v38 }
 0x11f   : > { %770 = vrot.lane.b32.xlu1 %v1997_v22, %s1794_s10 }
 0x120   : > { %v2421_v9 = vpop.permute.xlu0 %448 }
 0x121   : > { %v2423_v15 = vpop.permute.xlu1 %640 }
 0x122   : > { %794 = vrot.lane.b32.xlu0 %v1979_v20, %s1793_s9 }
 0x123   : > { %482 = vrot.lane.b32.xlu1 %v2045_v34, %s1791_s7 }
 0x124   : > { %v687_v37 = vpop.permute.xlu0 %686 }
 0x125   : > { %v757_v44 = vpop.permute.xlu1 %756  ;;  %v753_v46 = vsel %vm411_vm7, %v745_v36, %v687_v37 }
 0x126   : > { %504 = vrot.lane.b32.xlu0 %v1979_v20, %s1795_s11  ;;  %1724 = vmatmul.mubr.msk.f32.gmra.mrb[4].mxu1 %vm926_vm8, %v753_v46 }
 0x127   : > { %816 = vrot.lane.b32.xlu1 %v1997_v22, %s1785_s18 }
 0x128   : > { %v781_v48 = vpop.permute.xlu0 %780 }
 0x129   : > { %v2437_v8 = vpop.permute.xlu1 %426  ;;  %v852_v46 = vsel %vm356_vm9, %v757_v44, %v781_v48 }
 0x12a   : > { %506 = vrot.lane.b32.xlu0 %v2088_v54, %s1795_s11  ;;  %v860_v44 = vsel %vm357_vm1, %v852_v46, %v781_v48 }
 0x12b   : > { %818 = vrot.lane.b32.xlu1 %v2045_v34, %s1785_s18  ;;  %v532_v34 = vsel %vm366_vm2, %v524_v55, %v1836_v1 }
 0x12c   : > { %v2446_v4 = vpop.permute.xlu0 %450  ;;  %v540_v26 = vsel %vm375_vm3, %v532_v34, %v2011_v23 }
 0x12d   : > { %v469_v62 = vpop.permute.xlu1 %468  ;;  %v548_v5 = vsel %vm384_vm4, %v540_v26, %v2011_v23 }
 0x12e   : > { %840 = vrot.lane.b32.xlu0 %v1979_v20, %s1792_s8  ;;  %v556_v52 = vsel %vm393_vm5, %v548_v5, %v469_v62 }
 0x12f   : > { %842 = vrot.lane.b32.xlu1 %v2088_v54, %s1792_s8  ;;  %v706_v54 = vsel %vm357_vm1, %v2339_v45, %v1964_v19  ;;  %v541_v45 = vsel %vm375_vm3, %v533_v16, %v2017_v25 }
 0x130   : > { %v2454_v61 = vpop.permute.xlu0 %642  ;;  %v714_v1 = vsel %vm366_vm2, %v706_v54, %v2366_v0  ;;  %v549_v3 = vsel %vm384_vm4, %v541_v45, %v2017_v25  ;;  %v707_v25 = vsel %vm357_vm1, %v2364_v29, %v1979_v20 }
 0x131   : > { %v665_v24 = vpop.permute.xlu1 %664  ;;  %v722_v19 = vsel %vm375_vm3, %v714_v1, %v2366_v0 }
 0x132   : > { %v730_v23 = vsel %vm384_vm4, %v722_v19, %v2423_v15 }
 0x133   : > { %v738_v37 = vsel %vm393_vm5, %v730_v23, %v665_v24 }
 0x134   : > { %v759_v42 = vpop.permute.xlu0 %758  ;;  %v746_v13 = vsel %vm402_vm6, %v738_v37, %v665_v24  ;;  %v715_v24 = vsel %vm366_vm2, %v707_v25, %v2394_v60 }
 0x135   : > { %v783_v40 = vpop.permute.xlu1 %782 }
 0x136   : > { %v853_v19 = vsel %vm356_vm9, %v759_v42, %v783_v40 }
 0x138   : > { %v471_v33 = vpop.permute.xlu0 %470 }
 0x139   : > { %v493_v38 = vpop.permute.xlu1 %492  ;;  %v557_v62 = vsel %vm393_vm5, %v549_v3, %v471_v33  ;;  %v861_v3 = vsel %vm357_vm1, %v853_v19, %v783_v40 }
 0x13a   : > { %v564_v43 = vsel %vm402_vm6, %v556_v52, %v493_v38 }
 0x13b   : > { %v572_v56 = vsel %vm411_vm7, %v564_v43, %v493_v38  ;;  %v723_v38 = vsel %vm375_vm3, %v715_v24, %v2394_v60 }
 0x13c   : > { %1705 = vmatprep.mubr.msk.f32.mxu0 %vm926_vm8, %v572_v56  ;;  %v667_v35 = vpop.permute.xlu0 %666  ;;  %v731_v20 = vsel %vm384_vm4, %v723_v38, %v2454_v61 }
 0x13d   : > { %v805_v36 = vpop.permute.xlu1 %804  ;;  %v739_v43 = vsel %vm393_vm5, %v731_v20, %v667_v35 }
 0x13e   : > { %v868_v54 = vsel %vm366_vm2, %v860_v44, %v805_v36  ;;  %v747_v23 = vsel %vm402_vm6, %v739_v43, %v667_v35 }
 0x140   : > { %v495_v55 = vpop.permute.xlu0 %494 }
 0x141   : > { %v689_v34 = vpop.permute.xlu1 %688  ;;  %v565_v47 = vsel %vm402_vm6, %v557_v62, %v495_v55 }
 0x142   : > { %v754_v26 = vsel %vm411_vm7, %v746_v13, %v689_v34  ;;  %v573_v7 = vsel %vm411_vm7, %v565_v47, %v495_v55  ;;  %v518_v55 = vsel %vm356_vm9, %v2409_v39, %v2421_v9  ;;  %v519_v39 = vsel %vm356_vm9, %v2437_v8, %v2446_v4 }
 0x143   : > { %1726 = vmatprep.mubr.msk.f32.mxu1 %vm926_vm8, %v754_v26  ;;  %1706 = vmatmul.mubr.msk.f32.gmra.mrb[8].mxu0 %vm926_vm8, %v573_v7  ;;  %v526_v7 = vsel %vm357_vm1, %v518_v55, %v2421_v9  ;;  %v527_v24 = vsel %vm357_vm1, %v519_v39, %v2446_v4 }
 0x144   : > { %v807_v5 = vpop.permute.xlu0 %806  ;;  %v535_v9 = vsel %vm366_vm2, %v527_v24, %v1897_v14 }
 0x145   : > { %v829_v1 = vpop.permute.xlu1 %828  ;;  %v869_v46 = vsel %vm366_vm2, %v861_v3, %v807_v5 }
 0x146   : > { %v876_v52 = vsel %vm375_vm3, %v868_v54, %v829_v1 }
 0x147   : > { %v884_v33 = vsel %vm384_vm4, %v876_v52, %v829_v1  ;;  %v543_v52 = vsel %vm375_vm3, %v535_v9, %v2035_v32 }
 0x148   : > { %v892_v29 = vsel %vm393_vm5, %v884_v33, %v2058_v41  ;;  %v2510_v48 = vpop.permute.xlu0 %428  ;;  %v551_v20 = vsel %vm384_vm4, %v543_v52, %v2035_v32 }
 0x149   : > { %v2512_v16 = vpop.permute.xlu1 %452  ;;  %v900_v56 = vsel %vm402_vm6, %v892_v29, %v2091_v57 }
 0x14a   : > { %v908_v41 = vsel %vm411_vm7, %v900_v56, %v2091_v57  ;;  %v520_v39 = vsel %vm356_vm9, %v2510_v48, %v2512_v16 }
 0x14c   : > { %v691_v45 = vpop.permute.xlu0 %690 }
 0x14d   : > { %v761_v36 = vpop.permute.xlu1 %760  ;;  %v755_v37 = vsel %vm411_vm7, %v747_v23, %v691_v45 }
 0x14e   : > { %1727 = vmatmul.mubr.msk.f32.gmra.mrb[6].mxu1 %vm926_vm8, %v755_v37 }
 0x14f   : > { %1729 = vmatprep.mubr.msk.f32.mxu1 %vm926_vm8, %v908_v41 }
 0x150   : > { %v785_v13 = vpop.permute.xlu0 %784 }
 0x151   : > { %v831_v62 = vpop.permute.xlu1 %830  ;;  %v854_v14 = vsel %vm356_vm9, %v761_v36, %v785_v13 }
 0x152   : > { %v877_v42 = vsel %vm375_vm3, %v869_v46, %v831_v62  ;;  %v862_v23 = vsel %vm357_vm1, %v854_v14, %v785_v13 }
 0x153   : > { %v885_v35 = vsel %vm384_vm4, %v877_v42, %v831_v62 }
 0x154   : > { %v893_v34 = vsel %vm393_vm5, %v885_v35, %v2080_v51  ;;  %v431_v57 = vpop.permute.xlu0 %430  ;;  %v534_v51 = vsel %vm366_vm2, %v526_v7, %v1883_v11 }
 0x155   : > { %v455_v47 = vpop.permute.xlu1 %454  ;;  %v901_v40 = vsel %vm402_vm6, %v893_v34, %v2111_v63 }
 0x156   : > { %v909_v26 = vsel %vm411_vm7, %v901_v40, %v2111_v63  ;;  %v542_v63 = vsel %vm375_vm3, %v534_v51, %v2023_v28 }
 0x157   : > { %1730 = vmatmul.mubr.msk.f32.gmra.mrb[8].mxu1 %vm926_vm8, %v909_v26  ;;  %v550_v1 = vsel %vm384_vm4, %v542_v63, %v2023_v28  ;;  %v528_v63 = vsel %vm357_vm1, %v520_v39, %v2512_v16 }
 0x158   : > { %v473_v25 = vpop.permute.xlu0 %472 }
 0x159   : > { %v763_v44 = vpop.permute.xlu1 %762  ;;  %v558_v8 = vsel %vm393_vm5, %v550_v1, %v473_v25 }
 0x15c   : > { %v787_v54 = vpop.permute.xlu0 %786 }
 0x15d   : > { %v475_v5 = vpop.permute.xlu1 %474  ;;  %v855_v46 = vsel %vm356_vm9, %v763_v44, %v787_v54 }
 0x15e   : > { %v559_v28 = vsel %vm393_vm5, %v551_v20, %v475_v5  ;;  %v863_v55 = vsel %vm357_vm1, %v855_v46, %v787_v54  ;;  %v521_v54 = vsel %vm356_vm9, %v431_v57, %v455_v47 }
 0x15f   : > { %v529_v9 = vsel %vm357_vm1, %v521_v54, %v455_v47 }
 0x160   : > { %v497_v11 = vpop.permute.xlu0 %496 }
 0x161   : > { %v809_v33 = vpop.permute.xlu1 %808  ;;  %v566_v4 = vsel %vm402_vm6, %v558_v8, %v497_v11 }
 0x162   : > { %v574_v38 = vsel %vm411_vm7, %v566_v4, %v497_v11  ;;  %v870_v45 = vsel %vm366_vm2, %v862_v23, %v809_v33 }
 0x163   : > { %1708 = vmatprep.mubr.msk.f32.mxu0 %vm926_vm8, %v574_v38 }
 0x164   : > { %v499_v29 = vpop.permute.xlu0 %498 }
 0x165   : > { %v811_v43 = vpop.permute.xlu1 %810  ;;  %v567_v56 = vsel %vm402_vm6, %v559_v28, %v499_v29 }
 0x166   : > { %v575_v19 = vsel %vm411_vm7, %v567_v56, %v499_v29  ;;  %v871_v34 = vsel %vm366_vm2, %v863_v55, %v811_v43 }
 0x167   : > { %1709 = vmatmul.mubr.msk.f32.gmra.mrb[10].mxu0 %vm926_vm8, %v575_v19 }
 0x168   : > { %v833_v37 = vpop.permute.xlu0 %832 }
 0x169   : > { %v433_v32 = vpop.permute.xlu1 %432  ;;  %v878_v41 = vsel %vm375_vm3, %v870_v45, %v833_v37 }
 0x16a   : > { %v886_v36 = vsel %vm384_vm4, %v878_v41, %v833_v37 }
 0x16b   : > { %v894_v3 = vsel %vm393_vm5, %v886_v36, %v2144_v30 }
 0x16c   : > { %v2573_v62 = vpop.permute.xlu0 %456  ;;  %v902_v13 = vsel %vm402_vm6, %v894_v3, %v2201_v12 }
 0x16d   : > { %v765_v42 = vpop.permute.xlu1 %764  ;;  %v910_v35 = vsel %vm411_vm7, %v902_v13, %v2201_v12  ;;  %v522_v3 = vsel %vm356_vm9, %v433_v32, %v2573_v62 }
 0x16e   : > { %1732 = vmatprep.mubr.msk.f32.mxu1 %vm926_vm8, %v910_v35  ;;  %v530_v32 = vsel %vm357_vm1, %v522_v3, %v2573_v62 }
 0x170   : > { %v789_v40 = vpop.permute.xlu0 %788 }
 0x171   : > { %v835_v26 = vpop.permute.xlu1 %834 }
 0x172   : > { %v879_v30 = vsel %vm375_vm3, %v871_v34, %v835_v26 }
 0x173   : > { %v887_v7 = vsel %vm384_vm4, %v879_v30, %v835_v26 }
 0x174   : > { %v895_v25 = vsel %vm393_vm5, %v887_v7, %v2178_v50  ;;  %v435_v12 = vpop.permute.xlu0 %434  ;;  %v536_v50 = vsel %vm366_vm2, %v528_v63, %v1930_v17 }
 0x175   : > { %v459_v44 = vpop.permute.xlu1 %458  ;;  %v903_v51 = vsel %vm402_vm6, %v895_v25, %v2221_v2  ;;  %v544_v1 = vsel %vm375_vm3, %v536_v50, %v2099_v59 }
 0x176   : > { %v911_v24 = vsel %vm411_vm7, %v903_v51, %v2221_v2  ;;  %v537_v2 = vsel %vm366_vm2, %v529_v9, %v1945_v18  ;;  %v552_v57 = vsel %vm384_vm4, %v544_v1, %v2099_v59  ;;  %v856_v59 = vsel %vm356_vm9, %v765_v42, %v789_v40 }
 0x177   : > { %1733 = vmatmul.mubr.msk.f32.gmra.mrb[10].mxu1 %vm926_vm8, %v911_v24  ;;  %v545_v17 = vsel %vm375_vm3, %v537_v2, %v2117_v6  ;;  %v864_v19 = vsel %vm357_vm1, %v856_v59, %v789_v40 }
 0x178   : > { %v477_v5 = vpop.permute.xlu0 %476  ;;  %v553_v18 = vsel %vm384_vm4, %v545_v17, %v2117_v6 }
 0x179   : > { %v767_v48 = vpop.permute.xlu1 %766  ;;  %v560_v33 = vsel %vm393_vm5, %v552_v57, %v477_v5 }
 0x17c   : > { %v791_v8 = vpop.permute.xlu0 %790 }
 0x17d   : > { %v479_v52 = vpop.permute.xlu1 %478  ;;  %v2604_v16 = vpop.f32.mrb[0].mxu0  ;;  %v857_v23 = vsel %vm356_vm9, %v767_v48, %v791_v8 }
 0x17e   : > { %v2608_v11 = vpop.f32.mrb[1].mxu0  ;;  %v561_v14 = vsel %vm393_vm5, %v553_v18, %v479_v52  ;;  %v865_v46 = vsel %vm357_vm1, %v857_v23, %v791_v8 }
 0x180   : > { %v501_v47 = vpop.permute.xlu0 %500 }
 0x181   : > { %v813_v4 = vpop.permute.xlu1 %812  ;;  %v568_v38 = vsel %vm402_vm6, %v560_v33, %v501_v47 }
 0x182   : > { %v576_v20 = vsel %vm411_vm7, %v568_v38, %v501_v47  ;;  %v872_v6 = vsel %vm366_vm2, %v864_v19, %v813_v4 }
 0x183   : > { %1711 = vmatprep.mubr.msk.f32.mxu0 %vm926_vm8, %v576_v20 }
 0x184   : > { %v503_v28 = vpop.permute.xlu0 %502 }
 0x185   : > { %v815_v29 = vpop.permute.xlu1 %814  ;;  %v569_v43 = vsel %vm402_vm6, %v561_v14, %v503_v28 }
 0x186   : > { %v577_v56 = vsel %vm411_vm7, %v569_v43, %v503_v28  ;;  %v873_v13 = vsel %vm366_vm2, %v865_v46, %v815_v29 }
 0x187   : > { %1712 = vmatmul.mubr.msk.f32.gmra.mrb[12].mxu0 %vm926_vm8, %v577_v56 }
 0x188   : > { %v837_v45 = vpop.permute.xlu0 %836 }
 0x189   : > { %v769_v37 = vpop.permute.xlu1 %768  ;;  %v880_v41 = vsel %vm375_vm3, %v872_v6, %v837_v45 }
 0x18a   : > { %v888_v36 = vsel %vm384_vm4, %v880_v41, %v837_v45 }
 0x18b   : > { %v896_v42 = vsel %vm393_vm5, %v888_v36, %v2254_v49  ;;  %v523_v49 = vsel %vm356_vm9, %v435_v12, %v459_v44 }
 0x18c   : > { %v793_v35 = vpop.permute.xlu0 %792  ;;  %v904_v34 = vsel %vm402_vm6, %v896_v42, %v2319_v53  ;;  %v531_v24 = vsel %vm357_vm1, %v523_v49, %v459_v44 }
 0x18d   : > { %v839_v55 = vpop.permute.xlu1 %838  ;;  %v912_v26 = vsel %vm411_vm7, %v904_v34, %v2319_v53  ;;  %v538_v53 = vsel %vm366_vm2, %v530_v32, %v1982_v21  ;;  %v539_v54 = vsel %vm366_vm2, %v531_v24, %v1997_v22  ;;  %v858_v22 = vsel %vm356_vm9, %v769_v37, %v793_v35  ;;  %v2715_v34 = vld [vmem:[%s3020_s2] ss:$0 sm:$0xff] }
 0x18e   : > { %v881_v40 = vsel %vm375_vm3, %v873_v13, %v839_v55  ;;  %1735 = vmatprep.mubr.msk.f32.mxu1 %vm926_vm8, %v912_v26  ;;  %v546_v12 = vsel %vm375_vm3, %v538_v53, %v2209_v27  ;;  %v866_v17 = vsel %vm357_vm1, %v858_v22, %v793_v35 }
 0x18f   : > { %v889_v30 = vsel %vm384_vm4, %v881_v40, %v839_v55  ;;  %v554_v5 = vsel %vm384_vm4, %v546_v12, %v2209_v27 }
 0x190   : > { %v897_v7 = vsel %vm393_vm5, %v889_v30, %v2284_v10  ;;  %v481_v39 = vpop.permute.xlu0 %480  ;;  %v2727_v30 = vadd.f32 %v2604_v16, %v2715_v34 }
 0x191   : > { %v771_v25 = vpop.permute.xlu1 %770  ;;  %v905_v51 = vsel %vm402_vm6, %v897_v7, %v2341_v58  ;;  %v562_v21 = vsel %vm393_vm5, %v554_v5, %v481_v39  ;;  %v2733_v7 = vadd.f32 %v2715_v34, %v2608_v11 }
 0x192   : > { %v913_v62 = vsel %vm411_vm7, %v905_v51, %v2341_v58  ;;  %v547_v58 = vsel %vm375_vm3, %v539_v54, %v2227_v31  ;;  %v1277_v51 = vmul.f32 %v2727_v30, %v2727_v30 }
 0x193   : > { %1736 = vmatmul.mubr.msk.f32.gmra.mrb[12].mxu1 %vm926_vm8, %v913_v62  ;;  %v555_v1 = vsel %vm384_vm4, %v547_v58, %v2227_v31  ;;  %v1276_v62 = vmul.f32 %v2733_v7, %v2733_v7 }
 0x194   : > { %v795_v63 = vpop.permute.xlu0 %794 }
 0x195   : > { %v483_v10 = vpop.permute.xlu1 %482  ;;  %v859_v27 = vsel %vm356_vm9, %v771_v25, %v795_v63 }
 0x196   : > { %v563_v8 = vsel %vm393_vm5, %v555_v1, %v483_v10  ;;  %v867_v47 = vsel %vm357_vm1, %v859_v27, %v795_v63 }
 0x198   : > { %v505_v48 = vpop.permute.xlu0 %504 }
 0x199   : > { %v817_v44 = vpop.permute.xlu1 %816  ;;  %v570_v50 = vsel %vm402_vm6, %v562_v21, %v505_v48 }
 0x19a   : > { %v578_v9 = vsel %vm411_vm7, %v570_v50, %v505_v48  ;;  %v874_v31 = vsel %vm366_vm2, %v866_v17, %v817_v44 }
 0x19b   : > { %1714 = vmatprep.mubr.msk.f32.mxu0 %vm926_vm8, %v578_v9 }
 0x19c   : > { %v507_v52 = vpop.permute.xlu0 %506 }
 0x19d   : > { %v819_v2 = vpop.permute.xlu1 %818  ;;  %v571_v57 = vsel %vm402_vm6, %v563_v8, %v507_v52 }
 0x19e   : > { %v579_v33 = vsel %vm411_vm7, %v571_v57, %v507_v52  ;;  %v875_v4 = vsel %vm366_vm2, %v867_v47, %v819_v2 }
 0x19f   : > { %1715 = vmatmul.mubr.msk.f32.gmra.mrb[14].mxu0 %vm926_vm8, %v579_v33 }
 0x1a0   : > { %v841_v38 = vpop.permute.xlu0 %840 }
 0x1a1   : > { %v843_v20 = vpop.permute.xlu1 %842  ;;  %v882_v18 = vsel %vm375_vm3, %v874_v31, %v841_v38 }
 0x1a2   : > { %v883_v59 = vsel %vm375_vm3, %v875_v4, %v843_v20  ;;  %v890_v14 = vsel %vm384_vm4, %v882_v18, %v841_v38  ;;  %v2682_v29 = vpop.f32.mrb[2].mxu0 }
 0x1a3   : > { %v891_v28 = vsel %vm384_vm4, %v883_v59, %v843_v20  ;;  %v898_v43 = vsel %vm393_vm5, %v890_v14, %v2366_v0  ;;  %v2688_v19 = vpop.f32.mrb[3].mxu0  ;;  %v2780_v18 = vadd.f32 %v2682_v29, %v2715_v34 }
 0x1a4   : > { %v899_v56 = vsel %vm393_vm5, %v891_v28, %v2394_v60  ;;  %v906_v23 = vsel %vm402_vm6, %v898_v43, %v2423_v15  ;;  %v2787_v14 = vadd.f32 %v2715_v34, %v2688_v19 }
 0x1a5   : > { %v907_v6 = vsel %vm402_vm6, %v899_v56, %v2454_v61  ;;  %v914_v45 = vsel %vm411_vm7, %v906_v23, %v2423_v15  ;;  %v1279_v43 = vmul.f32 %v2780_v18, %v2780_v18 }
 0x1a6   : > { %v915_v37 = vsel %vm411_vm7, %v907_v6, %v2454_v61  ;;  %v1719_v41 = vpop.f32.mrb[0].mxu1  ;;  %1738 = vmatprep.mubr.msk.f32.mxu1 %vm926_vm8, %v914_v45  ;;  %v1278_v19 = vmul.f32 %v2787_v14, %v2787_v14 }
 0x1a7   : > { %v1173_v0 = vpop.f32.mrb[1].mxu1  ;;  %1739 = vmatmul.mubr.msk.f32.gmra.mrb[14].mxu1 %vm926_vm8, %v915_v37  ;;  %v2742_v53 = vadd.f32 %v1719_v41, %v2715_v34 }
 0x1a8   : > { %v2749_v11 = vadd.f32 %v2715_v34, %v1173_v0 }
 0x1a9   : > { %v1301_v54 = vmul.f32 %v2742_v53, %v2742_v53 }
 0x1aa   : > { %v1300_v48 = vmul.f32 %v2749_v11, %v2749_v11 }
 0x1ca   : > { %v2700_v60 = vpop.f32.mrb[4].mxu0 }
 0x1cb   : > { %v2702_v36 = vpop.f32.mrb[5].mxu0 }
 0x1d2   : > { %v1722_v3 = vpop.f32.mrb[2].mxu1 }
 0x1d3   : > { %v1183_v46 = vpop.f32.mrb[3].mxu1  ;;  %v2794_v56 = vadd.f32 %v1722_v3, %v2715_v34 }
 0x1d4   : > { %v2801_v6 = vadd.f32 %v2715_v34, %v1183_v46 }
 0x1d5   : > { %v1303_v0 = vmul.f32 %v2794_v56, %v2794_v56 }
 0x1d6   : > { %v1302_v46 = vmul.f32 %v2801_v6, %v2801_v6 }
 0x1f1   : > { %v2704_v42 = vpop.f32.mrb[6].mxu0 }
 0x1f2   : > { %v2706_v13 = vpop.f32.mrb[7].mxu0 }
 0x1f9   : > { %v2708_v15 = vpop.f32.mrb[4].mxu1 }
 0x1fa   : > { %v2710_v35 = vpop.f32.mrb[5].mxu1 }
 0x216   : > { %v1707_v61 = vpop.f32.mrb[8].mxu0 }
 0x217   : > { %v1133_v55 = vpop.f32.mrb[9].mxu0  ;;  %v2718_v40 = vadd.f32 %v1707_v61, %v2715_v34 }
 0x218   : > { %v2721_v26 = vadd.f32 %v2715_v34, %v1133_v55 }
 0x219   : > { %v1285_v39 = vmul.f32 %v2718_v40, %v2718_v40  ;;  %v1253_v16 = vadd.f32 %v2718_v40, %v2727_v30 }
 0x21a   : > { %v1284_v25 = vmul.f32 %v2721_v26, %v2721_v26  ;;  %v1252_v24 = vadd.f32 %v2721_v26, %v2733_v7 }
 0x21b   : > { %v1293_v12 = vadd.f32 %v1285_v39, %v1277_v51  ;;  %v1261_v58 = vadd.f32 %v1253_v16, %v2742_v53 }
 0x21c   : > { %v1292_v63 = vadd.f32 %v1284_v25, %v1276_v62  ;;  %v1260_v50 = vadd.f32 %v1252_v24, %v2749_v11 }
 0x21d   : > { %v1309_v22 = vadd.f32 %v1301_v54, %v1293_v12 }
 0x21e   : > { %v1308_v52 = vadd.f32 %v1300_v48, %v1292_v63 }
 0x221   : > { %v2723_v32 = vpop.f32.mrb[6].mxu1 }
 0x222   : > { %v2729_v49 = vpop.f32.mrb[7].mxu1 }
 0x22a   : > { %v1731_v10 = vpop.f32.mrb[8].mxu1 }
 0x22b   : > { %v2756_v5 = vadd.f32 %v1731_v10, %v2715_v34  ;;  %v1213_v21 = vpop.f32.mrb[9].mxu1 }
 0x22c   : > { %v2762_v44 = vadd.f32 %v2715_v34, %v1213_v21 }
 0x22d   : > { %v1317_v9 = vmul.f32 %v2756_v5, %v2756_v5  ;;  %v1269_v1 = vadd.f32 %v1261_v58, %v2756_v5 }
 0x22e   : > { %v1316_v27 = vmul.f32 %v2762_v44, %v2762_v44  ;;  %v1268_v8 = vadd.f32 %v1260_v50, %v2762_v44 }
 0x22f   : > { %v1335_v2 = vsel %vm357_vm1, %v1269_v1, 0.0  ;;  %v1325_v57 = vadd.f32 %v1317_v9, %v1309_v22 }
 0x230   : > { %1336 = vadd.xlane.f32.xlu1 %v1335_v2  ;;  %v1332_v33 = vsel %vm357_vm1, %v1268_v8, 0.0  ;;  %v1324_v17 = vadd.f32 %v1316_v27, %v1308_v52  ;;  %v2834_v8 = vadd.f32 %v2700_v60, %v2715_v34  ;;  %v2841_v2 = vadd.f32 %v2715_v34, %v2702_v36 }
 0x231   : > { %1333 = vadd.xlane.f32.xlu0 %v1332_v33  ;;  %v1372_v47 = vsel %vm357_vm1, %v1325_v57, 0.0  ;;  %v2857_v36 = vadd.f32 %v2715_v34, %v2710_v35 }
 0x232   : > { %v1369_v31 = vsel %vm357_vm1, %v1324_v17, 0.0  ;;  %v1281_v33 = vmul.f32 %v2834_v8, %v2834_v8  ;;  %v2849_v17 = vadd.f32 %v2708_v15, %v2715_v34 }
 0x233   : > { %v1304_v35 = vmul.f32 %v2857_v36, %v2857_v36 }
 0x234   : > { %1373 = vadd.xlane.f32.xlu1 %v1372_v47  ;;  %v1305_v15 = vmul.f32 %v2849_v17, %v2849_v17 }
 0x235   : > { %1370 = vadd.xlane.f32.xlu0 %v1369_v31  ;;  %v1280_v31 = vmul.f32 %v2841_v2, %v2841_v2 }
 0x23a   : > { %v1710_v4 = vpop.f32.mrb[10].mxu0 }
 0x23b   : > { %v1143_v38 = vpop.f32.mrb[11].mxu0  ;;  %v2776_v20 = vadd.f32 %v1710_v4, %v2715_v34 }
 0x23c   : > { %v2783_v59 = vadd.f32 %v2715_v34, %v1143_v38 }
 0x23d   : > { %v1287_v28 = vmul.f32 %v2776_v20, %v2776_v20  ;;  %v1255_v29 = vadd.f32 %v2776_v20, %v2780_v18 }
 0x23e   : > { %v1286_v23 = vmul.f32 %v2783_v59, %v2783_v59  ;;  %v1254_v37 = vadd.f32 %v2783_v59, %v2787_v14 }
 0x23f   : > { %v1295_v45 = vadd.f32 %v1287_v28, %v1279_v43  ;;  %v1263_v39 = vadd.f32 %v1255_v29, %v2794_v56 }
 0x240   : > { %v1294_v3 = vadd.f32 %v1286_v23, %v1278_v19  ;;  %v1262_v24 = vadd.f32 %v1254_v37, %v2801_v6 }
 0x241   : > { %v1311_v62 = vadd.f32 %v1303_v0, %v1295_v45 }
 0x242   : > { %v1310_v21 = vadd.f32 %v1302_v46, %v1294_v3 }
 0x24a   : > { %v1734_v41 = vpop.f32.mrb[10].mxu1 }
 0x24b   : > { %v2810_v61 = vadd.f32 %v1734_v41, %v2715_v34  ;;  %v1223_v55 = vpop.f32.mrb[11].mxu1 }
 0x24c   : > { %v2816_v25 = vadd.f32 %v2715_v34, %v1223_v55 }
 0x24d   : > { %v1319_v51 = vmul.f32 %v2810_v61, %v2810_v61  ;;  %v1271_v16 = vadd.f32 %v1263_v39, %v2810_v61 }
 0x24e   : > { %v1318_v12 = vmul.f32 %v2816_v25, %v2816_v25  ;;  %v1270_v54 = vadd.f32 %v1262_v24, %v2816_v25 }
 0x24f   : > { %v1341_v63 = vsel %vm357_vm1, %v1271_v16, 0.0  ;;  %v1327_v10 = vadd.f32 %v1319_v51, %v1311_v62 }
 0x250   : > { %1342 = vadd.xlane.f32.xlu0 %v1341_v63  ;;  %v1326_v48 = vadd.f32 %v1318_v12, %v1310_v21  ;;  %v1338_v50 = vsel %vm357_vm1, %v1270_v54, 0.0 }
 0x251   : > { %v1378_v58 = vsel %vm357_vm1, %v1327_v10, 0.0 }
 0x252   : > { %1379 = vadd.xlane.f32.xlu1 %v1378_v58  ;;  %v1375_v9 = vsel %vm357_vm1, %v1326_v48, 0.0  ;;  %v2890_v58 = vadd.f32 %v2715_v34, %v2706_v13  ;;  %v2907_v13 = vadd.f32 %v2715_v34, %v2729_v49 }
 0x254   : > { %1339 = vadd.xlane.f32.xlu0 %v1338_v50  ;;  %v2897_v50 = vadd.f32 %v2704_v42, %v2715_v34 }
 0x256   : > { %1376 = vadd.xlane.f32.xlu1 %v1375_v9 }
 0x25a   : > { %v1713_v1 = vpop.f32.mrb[12].mxu0 }
 0x25b   : > { %v1153_v22 = vpop.f32.mrb[13].mxu0  ;;  %v2830_v27 = vadd.f32 %v1713_v1, %v2715_v34 }
 0x25c   : > { %v2837_v52 = vadd.f32 %v2715_v34, %v1153_v22  ;;  %v1282_v22 = vmul.f32 %v2890_v58, %v2890_v58 }
 0x25d   : > { %v1289_v57 = vmul.f32 %v2830_v27, %v2830_v27  ;;  %v1257_v60 = vadd.f32 %v2830_v27, %v2834_v8 }
 0x25e   : > { %v1288_v47 = vmul.f32 %v2837_v52, %v2837_v52  ;;  %v1256_v38 = vadd.f32 %v2837_v52, %v2841_v2 }
 0x25f   : > { %v1297_v4 = vadd.f32 %v1289_v57, %v1281_v33  ;;  %v1265_v19 = vadd.f32 %v1257_v60, %v2849_v17  ;;  %v2911_v57 = vadd.f32 %v2723_v32, %v2715_v34  ;;  %v1306_v32 = vmul.f32 %v2907_v13, %v2907_v13 }
 0x260   : > { %v1296_v43 = vadd.f32 %v1288_v47, %v1280_v31  ;;  %v1264_v3 = vadd.f32 %v1256_v38, %v2857_v36  ;;  %v1283_v31 = vmul.f32 %v2897_v50, %v2897_v50 }
 0x261   : > { %v1313_v0 = vadd.f32 %v1305_v15, %v1297_v4 }
 0x262   : > { %v1312_v16 = vadd.f32 %v1304_v35, %v1296_v43 }
 0x266   : > { %v1737_v28 = vpop.f32.mrb[12].mxu1 }
 0x267   : > { %v2866_v29 = vadd.f32 %v1737_v28, %v2715_v34  ;;  %v1233_v23 = vpop.f32.mrb[13].mxu1 }
 0x268   : > { %v2872_v45 = vadd.f32 %v2715_v34, %v1233_v23 }
 0x269   : > { %v1321_v37 = vmul.f32 %v2866_v29, %v2866_v29  ;;  %v1273_v41 = vadd.f32 %v1265_v19, %v2866_v29 }
 0x26a   : > { %v1320_v55 = vmul.f32 %v2872_v45, %v2872_v45  ;;  %v1272_v51 = vadd.f32 %v1264_v3, %v2872_v45 }
 0x26b   : > { %v1347_v39 = vsel %vm357_vm1, %v1273_v41, 0.0  ;;  %v1329_v46 = vadd.f32 %v1321_v37, %v1313_v0  ;;  %v1307_v37 = vmul.f32 %v2911_v57, %v2911_v57 }
 0x26c   : > { %1348 = vadd.xlane.f32.xlu0 %v1347_v39  ;;  %v1328_v24 = vadd.f32 %v1320_v55, %v1312_v16  ;;  %v1344_v12 = vsel %vm357_vm1, %v1272_v51, 0.0 }
 0x26d   : > { %v1384_v62 = vsel %vm357_vm1, %v1329_v46, 0.0 }
 0x26e   : > { %1385 = vadd.xlane.f32.xlu1 %v1384_v62  ;;  %v1381_v63 = vsel %vm357_vm1, %v1328_v24, 0.0 }
 0x270   : > { %1345 = vadd.xlane.f32.xlu0 %v1344_v12 }
 0x272   : > { %1382 = vadd.xlane.f32.xlu1 %v1381_v63  ;;  %v1716_v10 = vpop.f32.mrb[14].mxu0 }
 0x273   : > { %v2886_v54 = vadd.f32 %v1716_v10, %v2715_v34  ;;  %v1163_v21 = vpop.f32.mrb[15].mxu0 }
 0x274   : > { %v2893_v48 = vadd.f32 %v2715_v34, %v1163_v21 }
 0x275   : > { %v1259_v1 = vadd.f32 %v2886_v54, %v2897_v50  ;;  %v1291_v42 = vmul.f32 %v2886_v54, %v2886_v54 }
 0x276   : > { %v1290_v9 = vmul.f32 %v2893_v48, %v2893_v48  ;;  %v1258_v33 = vadd.f32 %v2893_v48, %v2890_v58 }
 0x277   : > { %v1267_v38 = vadd.f32 %v1259_v1, %v2911_v57  ;;  %v1299_v15 = vadd.f32 %v1291_v42, %v1283_v31 }
 0x278   : > { %v1298_v60 = vadd.f32 %v1290_v9, %v1282_v22  ;;  %v1266_v23 = vadd.f32 %v1258_v33, %v2907_v13 }
 0x279   : > { %v1315_v55 = vadd.f32 %v1307_v37, %v1299_v15 }
 0x27a   : > { %v1740_v47 = vpop.f32.mrb[14].mxu1  ;;  %v1314_v35 = vadd.f32 %v1306_v32, %v1298_v60 }
 0x27b   : > { %v2920_v4 = vadd.f32 %v1740_v47, %v2715_v34  ;;  %v1243_v49 = vpop.f32.mrb[15].mxu1 }
 0x27c   : > { %v2926_v28 = vadd.f32 %v2715_v34, %v1243_v49 }
 0x27d   : > { %v1275_v43 = vadd.f32 %v1267_v38, %v2920_v4  ;;  %v1323_v41 = vmul.f32 %v2920_v4, %v2920_v4 }
 0x27e   : > { %v1322_v19 = vmul.f32 %v2926_v28, %v2926_v28  ;;  %v1274_v34 = vadd.f32 %v1266_v23, %v2926_v28 }
 0x27f   : > { %v1353_v0 = vsel %vm357_vm1, %v1275_v43, 0.0  ;;  %v1331_v51 = vadd.f32 %v1323_v41, %v1315_v55 }
 0x280   : > { %1354 = vadd.xlane.f32.xlu0 %v1353_v0  ;;  %v1330_v3 = vadd.f32 %v1322_v19, %v1314_v35  ;;  %v1350_v46 = vsel %vm357_vm1, %v1274_v34, 0.0 }
 0x281   : > { %v1390_v16 = vsel %vm357_vm1, %v1331_v51, 0.0 }
 0x282   : > { %v1387_v39 = vsel %vm357_vm1, %v1330_v3, 0.0 }
 0x283   : > { %1388 = vadd.xlane.f32.xlu1 %v1387_v39 }
 0x284   : > { %1351 = vadd.xlane.f32.xlu0 %v1350_v46 }
 0x288   : > { %1391 = vadd.xlane.f32.xlu0 %v1390_v16 }
 0x2bd   : > { %v1337_v24 = vpop.xlane.xlu1 %1336 }
 0x2be   : > { %v1334_v62 = vpop.xlane.xlu0 %1333 }
 0x2bf   : > { %v1356_v42 = vadd.f32 %v1337_v24, %v1334_v62 }
 0x2c1   : > { %v1374_v63 = vpop.xlane.xlu1 %1373 }
 0x2c2   : > { %v1371_v12 = vpop.xlane.xlu0 %1370 }
 0x2c3   : > { %v1393_v60 = vadd.f32 %v1374_v63, %v1371_v12 }
 0x2dd   : > { %v1343_v10 = vpop.xlane.xlu0 %1342 }
 0x2df   : > { %v1380_v21 = vpop.xlane.xlu1 %1379 }
 0x2e1   : > { %v1340_v9 = vpop.xlane.xlu0 %1339 }
 0x2e2   : > { %v1357_v47 = vadd.f32 %v1356_v42, %v1340_v9 }
 0x2e3   : > { %v1377_v1 = vpop.xlane.xlu1 %1376 }
 0x2e4   : > { %v1394_v31 = vadd.f32 %v1393_v60, %v1377_v1  ;;  %v1358_v38 = vadd.f32 %v1357_v47, %v1343_v10 }
 0x2e6   : > { %v1395_v43 = vadd.f32 %v1394_v31, %v1380_v21 }
 0x2f9   : > { %v1349_v22 = vpop.xlane.xlu0 %1348 }
 0x2fb   : > { %v1386_v33 = vpop.xlane.xlu1 %1385 }
 0x2fd   : > { %v1346_v49 = vpop.xlane.xlu0 %1345 }
 0x2fe   : > { %v1359_v15 = vadd.f32 %v1358_v38, %v1346_v49 }
 0x2ff   : > { %v1383_v32 = vpop.xlane.xlu1 %1382 }
 0x300   : > { %v1396_v19 = vadd.f32 %v1395_v43, %v1383_v32  ;;  %v1360_v35 = vadd.f32 %v1359_v15, %v1349_v22  ;;  %v1418_v32 = vlaneseq  ;;  %v1411_v43 = vld [vmem:[%s3020_s2 + $0x1] sm:$0x1] }
 0x302   : > { %v1397_v0 = vadd.f32 %v1396_v19, %v1386_v33  ;;  %v1419_v15 = vshrl.u32 %v1418_v32, 7 }
 0x30d   : > { %v1355_v23 = vpop.xlane.xlu0 %1354 }
 0x310   : > { %v1389_v37 = vpop.xlane.xlu1 %1388 }
 0x311   : > { %v1352_v41 = vpop.xlane.xlu0 %1351  ;;  %v1398_v3 = vadd.f32 %v1397_v0, %v1389_v37  ;;  %v1412_v37 = vld [vmem:[%s3020_s2 + $0x2] sm:$0x1] }
 0x312   : > { %v1361_v34 = vadd.f32 %v1360_v35, %v1352_v41 }
 0x314   : > { %v1362_v55 = vadd.f32 %v1361_v34, %v1355_v23  ;;  %v1420_v23 = vsub.s32 0, %v1419_v15 }
 0x315   : > { %v1392_v39 = vpop.xlane.xlu0 %1391 }
 0x316   : > { %v1363_v46 = vrot.slane %v1362_v55, 4  ;;  %v1399_v51 = vadd.f32 %v1398_v3, %v1392_v39 }
 0x318   : > { %v1364_v16 = vadd.f32 %v1363_v46, %v1362_v55  ;;  %v1400_v62 = vrot.slane %v1399_v51, 4 }
 0x31a   : > { %v1365_v24 = vrot.slane %v1364_v16, 2  ;;  %v1401_v12 = vadd.f32 %v1400_v62, %v1399_v51 }
 0x31c   : > { %v1366_v63 = vadd.f32 %v1365_v24, %v1364_v16  ;;  %v1402_v10 = vrot.slane %v1401_v12, 2 }
 0x31e   : > { %v1367_v9 = vrot.slane %v1366_v63, 1  ;;  %v1403_v21 = vadd.f32 %v1402_v10, %v1401_v12 }
 0x320   : > { %v1368_v1 = vadd.f32 %v1367_v9, %v1366_v63  ;;  %v1404_v42 = vrot.slane %v1403_v21, 1 }
 0x322   : > { %v1406_v22 = vmul.f32 0.00048828125, %v1368_v1  ;;  %v1405_v60 = vadd.f32 %v1404_v42, %v1403_v21 }
 0x324   : > { %v1408_v47 = vmul.f32 %v1406_v22, %v1406_v22  ;;  %v1407_v33 = vmul.f32 0.00048828125, %v1405_v60 }
 0x326   : > { %v1409_v31 = vsub.f32 %v1407_v33, %v1408_v47 }
 0x328   : > { %v1410_v49 = vmax.f32 %v1409_v31, 0.0 }
 0x32a   : > { %v1413_v38 = vadd.f32 1e-05, %v1410_v49 }
 0x32c   : > { %1775 = vrsqrt.f32 %v1413_v38 }
 0x336   : > { %v1776_v19 = vpop.eup %1775 }
 0x337   : > { %v1415_v35 = vmul.f32 %v1776_v19, %v1411_v43 }
 0x339   : > { %v1416_v41 = vmul.f32 %v1415_v35, %v1406_v22  ;;  %v1421_v0 = vrot.slane %v1415_v35, %v1420_v23 }
 0x33b   : > { %v1417_v34 = vsub.f32 %v1412_v37, %v1416_v41  ;;  %v1426_v3 = vmul.f32 %v1421_v0, %v2733_v7  ;;  %v1427_v55 = vmul.f32 %v1421_v0, %v2727_v30  ;;  %v1428_v39 = vmul.f32 %v1421_v0, %v2787_v14 }
 0x33c   : > { %v1429_v46 = vmul.f32 %v1421_v0, %v2780_v18  ;;  %v1430_v51 = vmul.f32 %v1421_v0, %v2841_v2  ;;  %v1431_v16 = vmul.f32 %v1421_v0, %v2834_v8  ;;  %v1432_v62 = vmul.f32 %v1421_v0, %v2890_v58 }
 0x33d   : > { %v1425_v24 = vrot.slane %v1417_v34, %v1420_v23  ;;  %v1433_v12 = vmul.f32 %v1421_v0, %v2897_v50  ;;  %v1442_v63 = vmul.f32 %v1421_v0, %v2721_v26  ;;  %v1443_v10 = vmul.f32 %v1421_v0, %v2718_v40 }
 0x33e   : > { %v1444_v7 = vmul.f32 %v1421_v0, %v2783_v59  ;;  %v1445_v30 = vmul.f32 %v1421_v0, %v2776_v20  ;;  %v1446_v14 = vmul.f32 %v1421_v0, %v2837_v52  ;;  %v1447_v18 = vmul.f32 %v1421_v0, %v2830_v27 }
 0x33f   : > { %v2961_v2 = vadd.f32 %v1426_v3, %v1425_v24  ;;  %v2963_v8 = vadd.f32 %v1427_v55, %v1425_v24  ;;  %v2965_v58 = vadd.f32 %v1428_v39, %v1425_v24  ;;  %v2967_v9 = vadd.f32 %v1429_v46, %v1425_v24 }
 0x340   : > { %v2969_v50 = vadd.f32 %v1430_v51, %v1425_v24  ;;  %v2971_v26 = vadd.f32 %v1431_v16, %v1425_v24  ;;  %v2973_v40 = vadd.f32 %v1432_v62, %v1425_v24  ;;  %v2975_v59 = vadd.f32 %v1433_v12, %v1425_v24 }
 0x341   : > { %v1448_v20 = vmul.f32 %v1421_v0, %v2893_v48  ;;  %v1449_v27 = vmul.f32 %v1421_v0, %v2886_v54  ;;  %v1450_v52 = vadd.f32 %v1442_v63, %v1425_v24  ;;  %v1451_v21 = vadd.f32 %v1443_v10, %v1425_v24 }
 0x342   : > { %v1452_v1 = vadd.f32 %v1444_v7, %v1425_v24  ;;  %v1453_v42 = vadd.f32 %v1445_v30, %v1425_v24  ;;  %v1454_v22 = vadd.f32 %v1446_v14, %v1425_v24  ;;  %v1455_v60 = vadd.f32 %v1447_v18, %v1425_v24 }
 0x343   : > { %v1456_v47 = vadd.f32 %v1448_v20, %v1425_v24  ;;  %v1457_v33 = vadd.f32 %v1449_v27, %v1425_v24  ;;  %v1458_v31 = vmul.f32 %v1421_v0, %v2749_v11  ;;  %v1459_v49 = vmul.f32 %v1421_v0, %v2742_v53 }
 0x344   : > { %v1460_v38 = vmul.f32 %v1421_v0, %v2801_v6  ;;  %v1461_v32 = vmul.f32 %v1421_v0, %v2794_v56  ;;  %v1462_v48 = vmul.f32 %v1421_v0, %v2857_v36  ;;  %v1463_v54 = vmul.f32 %v1421_v0, %v2849_v17 }
 0x345   : > { %v1464_v15 = vmul.f32 %v1421_v0, %v2907_v13  ;;  %v1465_v43 = vmul.f32 %v1421_v0, %v2911_v57  ;;  %v1466_v23 = vadd.f32 %v1458_v31, %v1425_v24  ;;  %v1467_v19 = vadd.f32 %v1459_v49, %v1425_v24 }
 0x346   : > { %v1468_v35 = vadd.f32 %v1460_v38, %v1425_v24  ;;  %v1469_v37 = vadd.f32 %v1461_v32, %v1425_v24  ;;  %v1470_v41 = vadd.f32 %v1462_v48, %v1425_v24  ;;  %v1471_v11 = vadd.f32 %v1463_v54, %v1425_v24 }
 0x347   : > { %v1472_v34 = vadd.f32 %v1464_v15, %v1425_v24  ;;  %v1473_v53 = vadd.f32 %v1465_v43, %v1425_v24  ;;  %v1474_v6 = vmul.f32 %v1421_v0, %v2762_v44  ;;  %v1475_v56 = vmul.f32 %v1421_v0, %v2756_v5 }
 0x348   : > { %v1476_v36 = vmul.f32 %v1421_v0, %v2816_v25  ;;  %v1477_v17 = vmul.f32 %v1421_v0, %v2810_v61  ;;  %v1478_v13 = vmul.f32 %v1421_v0, %v2872_v45  ;;  %v1479_v57 = vmul.f32 %v1421_v0, %v2866_v29 }
 0x349   : > { %v1480_v3 = vmul.f32 %v1421_v0, %v2926_v28  ;;  %v1481_v55 = vmul.f32 %v1421_v0, %v2920_v4  ;;  %v1482_v39 = vadd.f32 %v1474_v6, %v1425_v24  ;;  %v1483_v46 = vadd.f32 %v1475_v56, %v1425_v24 }
 0x34a   : > { %v1484_v51 = vadd.f32 %v1476_v36, %v1425_v24  ;;  %v1485_v16 = vadd.f32 %v1477_v17, %v1425_v24  ;;  %v1486_v44 = vadd.f32 %v1478_v13, %v1425_v24  ;;  %v1487_v62 = vadd.f32 %v1479_v57, %v1425_v24 }
 0x34b   : > { %v1488_v5 = vadd.f32 %v1480_v3, %v1425_v24  ;;  %v1489_v12 = vadd.f32 %v1481_v55, %v1425_v24  ;;  %v1490_v25 = vmax.f32 %v2961_v2, %v1450_v52  ;;  %v1491_v61 = vmax.f32 %v2963_v8, %v1451_v21 }
 0x34c   : > { %v1492_v45 = vmax.f32 %v2965_v58, %v1452_v1  ;;  %v1493_v29 = vmax.f32 %v2967_v9, %v1453_v42  ;;  %v1494_v28 = vmax.f32 %v2969_v50, %v1454_v22  ;;  %v1495_v4 = vmax.f32 %v2971_v26, %v1455_v60 }
 0x34d   : > { %v1496_v0 = vmax.f32 %v2973_v40, %v1456_v47  ;;  %v1497_v63 = vmax.f32 %v2975_v59, %v1457_v33  ;;  %v1498_v10 = vmax.f32 %v1466_v23, %v1482_v39  ;;  %v1499_v7 = vmax.f32 %v1467_v19, %v1483_v46 }
 0x34e   : > { %v1500_v24 = vmax.f32 %v1468_v35, %v1484_v51  ;;  %v1501_v30 = vmax.f32 %v1469_v37, %v1485_v16  ;;  %v1502_v14 = vmax.f32 %v1470_v41, %v1486_v44  ;;  %v1503_v18 = vmax.f32 %v1471_v11, %v1487_v62 }
 0x34f   : > { %v1504_v2 = vmax.f32 %v1472_v34, %v1488_v5  ;;  %v1505_v8 = vmax.f32 %v1473_v53, %v1489_v12  ;;  %v1506_v58 = vmax.f32 %v1490_v25, %v1498_v10  ;;  %v1507_v20 = vmax.f32 %v1491_v61, %v1499_v7 }
 0x350   : > { %v1508_v9 = vmax.f32 %v1492_v45, %v1500_v24  ;;  %v1509_v50 = vmax.f32 %v1493_v29, %v1501_v30  ;;  %v1510_v26 = vmax.f32 %v1494_v28, %v1502_v14  ;;  %v1511_v40 = vmax.f32 %v1495_v4, %v1503_v18 }
 0x351   : > { %v1512_v27 = vmax.f32 %v1496_v0, %v1504_v2  ;;  %v1513_v59 = vmax.f32 %v1497_v63, %v1505_v8  ;;  %v1514_v52 = vmax.f32 %v1506_v58, 0.0  ;;  %v1515_v21 = vmax.f32 %v1507_v20, 0.0 }
 0x352   : > { %v1516_v1 = vmax.f32 %v1508_v9, 0.0  ;;  %v1517_v42 = vmax.f32 %v1509_v50, 0.0  ;;  %v1518_v22 = vmax.f32 %v1510_v26, 0.0  ;;  %v1519_v60 = vmax.f32 %v1511_v40, 0.0 }
 0x353   : > { %v1520_v47 = vmax.f32 %v1512_v27, 0.0  ;;  %v1521_v33 = vmax.f32 %v1513_v59, 0.0  ;;  %1522 = vst.msk [vmem:[%s170_s23] sm:$0xff] %vm357_vm1, %v1514_v52  ;;  %1523 = vst.msk [vmem:[%s170_s23 + $0x8] sm:$0xff] %vm357_vm1, %v1515_v21 }
 0x354   : > { %1524 = vst.msk [vmem:[%s170_s23 + $0x10] sm:$0xff] %vm357_vm1, %v1516_v1  ;;  %1525 = vst.msk [vmem:[%s170_s23 + $0x18] sm:$0xff] %vm357_vm1, %v1517_v42 }
 0x355   : > { %1526 = vst.msk [vmem:[%s170_s23 + $0x20] sm:$0xff] %vm357_vm1, %v1518_v22  ;;  %1527 = vst.msk [vmem:[%s170_s23 + $0x28] sm:$0xff] %vm357_vm1, %v1519_v60 }
 0x356   : > { %1528 = vst.msk [vmem:[%s170_s23 + $0x30] sm:$0xff] %vm357_vm1, %v1520_v47  ;;  %1529 = vst.msk [vmem:[%s170_s23 + $0x38] sm:$0xff] %vm357_vm1, %v1521_v33 }
 0x357 PF: > { %s13_s12 = sadd.s32 1, %s1783_s12  }
 0x358   : > { %p10_p4 = scmp.ge.s32.totalorder %s13_s12, 4  }
 0x35a   :  { %12 = sbr.rel (!%p10_p4) target bundleno = 1 (0x1), region = 63 }

</bundles_post_ra>
